<compile_context>
chip_gen: v6e
topology: v6e:2x2x1
jax: 0.10.0
libtpu: 0.0.40
codegen_flags: <defaults>
</compile_context>

<pallas_src>
import jax
import jax.numpy as jnp
from jax import lax
from jax.experimental import pallas as pl
from jax.experimental.pallas import tpu as pltpu


def lstm_acceptor_kernel(emb_ref, len_ref, wih_ref, whh_ref, b_ref,
                         w1_ref, b1_ref, w2_ref, b2_ref,
                         out_ref, h_scr, c_scr, gx_scr):
    T, B, D = emb_ref.shape
    H = whh_ref.shape[0]

    # ---- hoisted input projection: ONE batched MXU matmul for all steps ----
    # (T,B,D) f32 -> (T*B,D) is a layout-free collapse; cast to bf16 for MXU.
    emb_flat = emb_ref[...].reshape(T * B, D).astype(jnp.bfloat16)
    gx = jnp.dot(emb_flat, wih_ref[...],
                 preferred_element_type=jnp.float32) + b_ref[...]
    gx_scr[...] = gx.reshape(T, B, 4 * H)

    h_scr[...] = jnp.zeros_like(h_scr)
    c_scr[...] = jnp.zeros_like(c_scr)

    def step(t, carry):
        # Only work on the serial recurrence chain: one (B,H)x(H,4H) matmul.
        gates = gx_scr[t] + jnp.dot(h_scr[...].astype(jnp.bfloat16),
                                    whh_ref[...],
                                    preferred_element_type=jnp.float32)
        # PyTorch LSTMCell gate order: input, forget, cell(g), output.
        # NOTE: H=32 => sub-128 lane slices (masked ops); free when H % 128 == 0.
        i_g = jax.nn.sigmoid(gates[:, 0 * H:1 * H])
        f_g = jax.nn.sigmoid(gates[:, 1 * H:2 * H])
        g_g = jnp.tanh(gates[:, 2 * H:3 * H])
        o_g = jax.nn.sigmoid(gates[:, 3 * H:4 * H])

        c_new = f_g * c_scr[...] + i_g * g_g
        h_new = o_g * jnp.tanh(c_new)

        keep = len_ref[...] > t                       # (B, 1) bool
        h_scr[...] = jnp.where(keep, h_new, h_scr[...])
        c_scr[...] = jnp.where(keep, c_new, c_scr[...])
        return carry

    # Full unroll: gives the scheduler cross-step visibility.
    lax.fori_loop(0, T, step, 0, unroll=True)

    # classifier: Linear(H,16) -> ReLU -> Linear(16,1); tiny, one-shot, f32.
    hid = jnp.dot(h_scr[...], w1_ref[...],
                  preferred_element_type=jnp.float32) + b1_ref[...]
    hid = jnp.maximum(hid, 0.0)
    out_ref[...] = (jnp.dot(hid, w2_ref[...],
                            preferred_element_type=jnp.float32) + b2_ref[...])


def _round_up(x, m):
    return (x + m - 1) // m * m


def init_params(key, vocab_size, emb_dim, hidden_dim):
    ks = jax.random.split(key, 9)
    h_scale = 1.0 / jnp.sqrt(hidden_dim)
    emb_table = jax.random.normal(ks[0], (vocab_size, emb_dim), jnp.float32)
    w_ih = jax.random.uniform(ks[1], (4 * hidden_dim, emb_dim), jnp.float32,
                              -h_scale, h_scale)
    w_hh = jax.random.uniform(ks[2], (4 * hidden_dim, hidden_dim), jnp.float32,
                              -h_scale, h_scale)
    b_ih = jax.random.uniform(ks[3], (4 * hidden_dim,), jnp.float32,
                              -h_scale, h_scale)
    b_hh = jax.random.uniform(ks[4], (4 * hidden_dim,), jnp.float32,
                              -h_scale, h_scale)
    w1 = jax.random.uniform(ks[5], (16, hidden_dim), jnp.float32,
                            -h_scale, h_scale)
    b1 = jax.random.uniform(ks[6], (16,), jnp.float32, -h_scale, h_scale)
    w2 = jax.random.uniform(ks[7], (1, 16), jnp.float32, -0.25, 0.25)
    b2 = jax.random.uniform(ks[8], (1,), jnp.float32, -0.25, 0.25)
    return dict(emb_table=emb_table, w_ih=w_ih, w_hh=w_hh, b_ih=b_ih,
                b_hh=b_hh, w1=w1, b1=b1, w2=w2, b2=b2)


def lstm_acceptor_forward(x, lengths, params):
    """x: (B, T) int32 token ids, lengths: (B,) int32. Returns (B,) float32."""
    B, T = x.shape
    D = params["emb_table"].shape[1]
    H = params["w_hh"].shape[1]

    # Batch tiling: pad to a sublane multiple; 128-row tiles for large B so the
    # parallel batch grid axis can shard across TensorCores (v7x megacore).
    B_blk = _round_up(B, 8) if B <= 128 else 128
    B_pad = _round_up(B, B_blk)
    n_b = B_pad // B_blk

    # Embedding gather is glue (data-dependent gather stays in plain JAX).
    emb = params["emb_table"][x]                      # (B, T, D)
    emb_tm = jnp.transpose(emb, (1, 0, 2))            # (T, B, D) time-major
    lengths = lengths.astype(jnp.int32)
    if B_pad != B:
        emb_tm = jnp.pad(emb_tm, ((0, 0), (0, B_pad - B), (0, 0)))
        lengths = jnp.pad(lengths, (0, B_pad - B))

    wih_t = params["w_ih"].T.astype(jnp.bfloat16)     # (D, 4H) MXU operand
    whh_t = params["w_hh"].T.astype(jnp.bfloat16)     # (H, 4H) MXU operand
    b = (params["b_ih"] + params["b_hh"]).reshape(1, 4 * H).astype(jnp.float32)
    w1_t = params["w1"].T                             # (H, 16) f32
    b1 = params["b1"].reshape(1, 16)
    w2_t = params["w2"].T                             # (16, 1)
    b2 = params["b2"].reshape(1, 1)
    len2d = lengths.reshape(B_pad, 1)

    full = lambda bb: (0, 0)                          # weights: same block every step

    out = pl.pallas_call(
        lstm_acceptor_kernel,
        out_shape=jax.ShapeDtypeStruct((B_pad, 1), jnp.float32),
        grid=(n_b,),
        in_specs=[
            pl.BlockSpec((T, B_blk, D), lambda bb: (0, bb, 0)),   # emb, time-major
            pl.BlockSpec((B_blk, 1), lambda bb: (bb, 0)),         # lengths
            pl.BlockSpec((D, 4 * H), full),                       # W_ih^T
            pl.BlockSpec((H, 4 * H), full),                       # W_hh^T
            pl.BlockSpec((1, 4 * H), full),                       # fused bias
            pl.BlockSpec((H, 16), full),                          # W1^T
            pl.BlockSpec((1, 16), full),                          # b1
            pl.BlockSpec((16, 1), full),                          # W2^T
            pl.BlockSpec((1, 1), full),                           # b2
        ],
        out_specs=pl.BlockSpec((B_blk, 1), lambda bb: (bb, 0)),
        scratch_shapes=[
            pltpu.VMEM((B_blk, H), jnp.float32),          # h state
            pltpu.VMEM((B_blk, H), jnp.float32),          # c state
            pltpu.VMEM((T, B_blk, 4 * H), jnp.float32),   # hoisted gates_x
        ],
        compiler_params=pltpu.CompilerParams(
            dimension_semantics=("parallel",),   # shard batch blocks on v7x's 2 TCs
            # Budgeted for the smallest-VMEM chip (v7x: 64 MiB physical);
            # the demo shapes use only a few KiB.
            vmem_limit_bytes=32 * 1024 * 1024,
        ),
    )(emb_tm, len2d, wih_t, whh_t, b, w1_t, b1, w2_t, b2)
    return out[:B, 0]


def lstm_acceptor_reference(x, lengths, params, mirror_bf16=False):
    """Pure-JAX reference mirroring the PyTorch forward.

    mirror_bf16=True rounds the MXU matmul operands to bfloat16 exactly as the
    kernel does, allowing a tight numerical comparison.
    """
    q = (lambda a: a.astype(jnp.bfloat16).astype(jnp.float32)) if mirror_bf16 \
        else (lambda a: a)
    hp = jax.lax.Precision.HIGHEST
    emb = q(params["emb_table"][x])
    w_ih = q(params["w_ih"])
    w_hh = q(params["w_hh"])
    bias = params["b_ih"] + params["b_hh"]
    B, T, _ = emb.shape
    H = params["w_hh"].shape[1]
    h = jnp.zeros((B, H), jnp.float32)
    c = jnp.zeros((B, H), jnp.float32)
    for t in range(T):
        gates = (jnp.dot(emb[:, t], w_ih.T, precision=hp)
                 + jnp.dot(q(h), w_hh.T, precision=hp) + bias)
        i_g = jax.nn.sigmoid(gates[:, 0 * H:1 * H])
        f_g = jax.nn.sigmoid(gates[:, 1 * H:2 * H])
        g_g = jnp.tanh(gates[:, 2 * H:3 * H])
        o_g = jax.nn.sigmoid(gates[:, 3 * H:4 * H])
        c_new = f_g * c + i_g * g_g
        h_new = o_g * jnp.tanh(c_new)
        keep = (lengths > t)[:, None]
        h = jnp.where(keep, h_new, h)
        c = jnp.where(keep, c_new, c)
    hid = jnp.maximum(jnp.dot(h, params["w1"].T, precision=hp) + params["b1"],
                      0.0)
    return (jnp.dot(hid, params["w2"].T, precision=hp) + params["b2"])[:, 0]


if __name__ == "__main__":
    vocab_size, emb_dim, hidden_dim = 16, 8, 32
    B, T = 2, 8

    key = jax.random.PRNGKey(0)
    k_param, k_x, k_len = jax.random.split(key, 3)
    params = init_params(k_param, vocab_size, emb_dim, hidden_dim)

    x = jax.random.randint(k_x, (B, T), 0, vocab_size, dtype=jnp.int32)
    lengths = jnp.array([T, 5], dtype=jnp.int32)

    out = jax.block_until_ready(lstm_acceptor_forward(x, lengths, params))
    assert out.shape == (B,)

    # Tight check vs. a reference mirroring the kernel's bf16 MXU operands.
    ref_bf16 = lstm_acceptor_reference(x, lengths, params, mirror_bf16=True)
    assert jnp.allclose(out, ref_bf16, rtol=2e-3, atol=2e-3), (out, ref_bf16)

    # Loose check vs. the pure-f32 PyTorch-equivalent semantics.
    ref_f32 = lstm_acceptor_reference(x, lengths, params, mirror_bf16=False)
    assert jnp.allclose(out, ref_f32, rtol=5e-2, atol=5e-2), (out, ref_f32)

    print("KERNEL_OK")
</pallas_src>

<mosaic_0001>
module attributes {stable_mosaic.version = 11 : i64} {
  func.func @lstm_acceptor_kernel(%arg0: i32, %arg1: memref<8x8x8xf32, #tpu.memory_space<vmem>>, %arg2: memref<8x1xi32, #tpu.memory_space<vmem>>, %arg3: memref<8x128xbf16, #tpu.memory_space<vmem>>, %arg4: memref<32x128xbf16, #tpu.memory_space<vmem>>, %arg5: memref<1x128xf32, #tpu.memory_space<vmem>>, %arg6: memref<32x16xf32, #tpu.memory_space<vmem>>, %arg7: memref<1x16xf32, #tpu.memory_space<vmem>>, %arg8: memref<16x1xf32, #tpu.memory_space<vmem>>, %arg9: memref<1x1xf32, #tpu.memory_space<vmem>>, %arg10: memref<8x1xf32, #tpu.memory_space<vmem>>, %arg11: memref<8x32xf32, #tpu.memory_space<vmem>>, %arg12: memref<8x32xf32, #tpu.memory_space<vmem>>, %arg13: memref<8x8x128xf32, #tpu.memory_space<vmem>>) attributes {dimension_semantics = [#tpu.dimension_semantics<parallel>], iteration_bounds = array<i64: 1>, scalar_prefetch = 0 : i64, scratch_operands = 3 : i64, tpu.core_type = #tpu.core_type<tc>, window_params = [{transform_indices = @transform_0, window_bounds = array<i64: 8, 8, 8>}, {transform_indices = @transform_1, window_bounds = array<i64: 8, 1>}, {pipeline_mode = #tpu.pipeline_mode<synchronous>, transform_indices = @transform_2, window_bounds = array<i64: 8, 128>}, {pipeline_mode = #tpu.pipeline_mode<synchronous>, transform_indices = @transform_3, window_bounds = array<i64: 32, 128>}, {pipeline_mode = #tpu.pipeline_mode<synchronous>, transform_indices = @transform_4, window_bounds = array<i64: 1, 128>}, {pipeline_mode = #tpu.pipeline_mode<synchronous>, transform_indices = @transform_5, window_bounds = array<i64: 32, 16>}, {pipeline_mode = #tpu.pipeline_mode<synchronous>, transform_indices = @transform_6, window_bounds = array<i64: 1, 16>}, {pipeline_mode = #tpu.pipeline_mode<synchronous>, transform_indices = @transform_7, window_bounds = array<i64: 16, 1>}, {pipeline_mode = #tpu.pipeline_mode<synchronous>, transform_indices = @transform_8, window_bounds = array<i64: 1, 1>}, {transform_indices = @transform_9, window_bounds = array<i64: 8, 1>}]} {
    %c0 = arith.constant 0 : index
    %c0_0 = arith.constant 0 : index
    %c0_1 = arith.constant 0 : index
    %0 = vector.load %arg1[%c0, %c0_0, %c0_1] : memref<8x8x8xf32, #tpu.memory_space<vmem>>, vector<8x8x8xf32>
    %1 = vector.shape_cast %0 : vector<8x8x8xf32> to vector<64x8xf32>
    %2 = arith.truncf %1 : vector<64x8xf32> to vector<64x8xbf16>
    %c0_2 = arith.constant 0 : index
    %c0_3 = arith.constant 0 : index
    %3 = vector.load %arg3[%c0_2, %c0_3] : memref<8x128xbf16, #tpu.memory_space<vmem>>, vector<8x128xbf16>
    %cst = arith.constant dense<0.000000e+00> : vector<64x128xf32>
    %4 = tpu.matmul %2, %3, %cst {dimension_numbers = #tpu.dot_dimension_numbers<[1], [0], [0], [1], [0, 0, 1, 1], [], []>} : vector<64x8xbf16>, vector<8x128xbf16>, vector<64x128xf32> -> vector<64x128xf32>
    %c0_4 = arith.constant 0 : index
    %c0_5 = arith.constant 0 : index
    %5 = vector.load %arg5[%c0_4, %c0_5] : memref<1x128xf32, #tpu.memory_space<vmem>>, vector<1x128xf32>
    %6 = vector.broadcast %5 : vector<1x128xf32> to vector<64x128xf32>
    %7 = arith.addf %4, %6 : vector<64x128xf32>
    %8 = vector.shape_cast %7 : vector<64x128xf32> to vector<8x8x128xf32>
    %c0_6 = arith.constant 0 : index
    %c0_7 = arith.constant 0 : index
    %c0_8 = arith.constant 0 : index
    %9 = vector.load %arg13[%c0_6, %c0_7, %c0_8] : memref<8x8x128xf32, #tpu.memory_space<vmem>>, vector<8x8x128xf32>
    tpu.vector_store %arg13[%c0_6, %c0_7, %c0_8], %8 {strides = array<i32>} : memref<8x8x128xf32, #tpu.memory_space<vmem>>, vector<8x8x128xf32>,
    %cst_9 = arith.constant 0.000000e+00 : f32
    %10 = vector.broadcast %cst_9 : f32 to vector<8x32xf32>
    %c0_10 = arith.constant 0 : index
    %c0_11 = arith.constant 0 : index
    %11 = vector.load %arg11[%c0_10, %c0_11] : memref<8x32xf32, #tpu.memory_space<vmem>>, vector<8x32xf32>
    tpu.vector_store %arg11[%c0_10, %c0_11], %10 {strides = array<i32>} : memref<8x32xf32, #tpu.memory_space<vmem>>, vector<8x32xf32>,
    %cst_12 = arith.constant 0.000000e+00 : f32
    %12 = vector.broadcast %cst_12 : f32 to vector<8x32xf32>
    %c0_13 = arith.constant 0 : index
    %c0_14 = arith.constant 0 : index
    %13 = vector.load %arg12[%c0_13, %c0_14] : memref<8x32xf32, #tpu.memory_space<vmem>>, vector<8x32xf32>
    tpu.vector_store %arg12[%c0_13, %c0_14], %12 {strides = array<i32>} : memref<8x32xf32, #tpu.memory_space<vmem>>, vector<8x32xf32>,
    %c0_i32 = arith.constant 0 : i32
    %14 = arith.index_cast %c0_i32 : i32 to index
    %c0_15 = arith.constant 0 : index
    %c0_16 = arith.constant 0 : index
    %15 = vector.load %arg13[%14, %c0_15, %c0_16] : memref<8x8x128xf32, #tpu.memory_space<vmem>>, vector<1x8x128xf32>
    %16 = vector.shape_cast %15 : vector<1x8x128xf32> to vector<8x128xf32>
    %c0_17 = arith.constant 0 : index
    %c0_18 = arith.constant 0 : index
    %17 = vector.load %arg11[%c0_17, %c0_18] : memref<8x32xf32, #tpu.memory_space<vmem>>, vector<8x32xf32>
    %18 = arith.truncf %17 : vector<8x32xf32> to vector<8x32xbf16>
    %c0_19 = arith.constant 0 : index
    %c0_20 = arith.constant 0 : index
    %19 = vector.load %arg4[%c0_19, %c0_20] : memref<32x128xbf16, #tpu.memory_space<vmem>>, vector<32x128xbf16>
    %cst_21 = arith.constant dense<0.000000e+00> : vector<8x128xf32>
    %20 = tpu.matmul %18, %19, %cst_21 {dimension_numbers = #tpu.dot_dimension_numbers<[1], [0], [0], [1], [0, 0, 1, 1], [], []>} : vector<8x32xbf16>, vector<32x128xbf16>, vector<8x128xf32> -> vector<8x128xf32>
    %21 = arith.addf %16, %20 : vector<8x128xf32>
    %22 = vector.extract_strided_slice %21 {offsets = [0, 0], sizes = [8, 32], strides = [1, 1]} : vector<8x128xf32> to vector<8x32xf32>
    %23 = arith.negf %22 : vector<8x32xf32>
    %24 = math.exp %23 : vector<8x32xf32>
    %cst_22 = arith.constant 1.000000e+00 : f32
    %25 = vector.broadcast %cst_22 : f32 to vector<8x32xf32>
    %26 = arith.addf %25, %24 : vector<8x32xf32>
    %27 = arith.divf %25, %26 : vector<8x32xf32>
    %28 = vector.extract_strided_slice %21 {offsets = [0, 32], sizes = [8, 32], strides = [1, 1]} : vector<8x128xf32> to vector<8x32xf32>
    %29 = arith.negf %28 : vector<8x32xf32>
    %30 = math.exp %29 : vector<8x32xf32>
    %cst_23 = arith.constant 1.000000e+00 : f32
    %31 = vector.broadcast %cst_23 : f32 to vector<8x32xf32>
    %32 = arith.addf %31, %30 : vector<8x32xf32>
    %33 = arith.divf %31, %32 : vector<8x32xf32>
    %34 = vector.extract_strided_slice %21 {offsets = [0, 64], sizes = [8, 32], strides = [1, 1]} : vector<8x128xf32> to vector<8x32xf32>
    %35 = math.tanh %34 : vector<8x32xf32>
    %36 = vector.extract_strided_slice %21 {offsets = [0, 96], sizes = [8, 32], strides = [1, 1]} : vector<8x128xf32> to vector<8x32xf32>
    %37 = arith.negf %36 : vector<8x32xf32>
    %38 = math.exp %37 : vector<8x32xf32>
    %cst_24 = arith.constant 1.000000e+00 : f32
    %39 = vector.broadcast %cst_24 : f32 to vector<8x32xf32>
    %40 = arith.addf %39, %38 : vector<8x32xf32>
    %41 = arith.divf %39, %40 : vector<8x32xf32>
    %c0_25 = arith.constant 0 : index
    %c0_26 = arith.constant 0 : index
    %42 = vector.load %arg12[%c0_25, %c0_26] : memref<8x32xf32, #tpu.memory_space<vmem>>, vector<8x32xf32>
    %43 = arith.mulf %33, %42 : vector<8x32xf32>
    %44 = arith.mulf %27, %35 : vector<8x32xf32>
    %45 = arith.addf %43, %44 : vector<8x32xf32>
    %46 = math.tanh %45 : vector<8x32xf32>
    %47 = arith.mulf %41, %46 : vector<8x32xf32>
    %c0_27 = arith.constant 0 : index
    %c0_28 = arith.constant 0 : index
    %48 = vector.load %arg2[%c0_27, %c0_28] : memref<8x1xi32, #tpu.memory_space<vmem>>, vector<8x1xi32>
    %49 = vector.broadcast %c0_i32 : i32 to vector<8x1xi32>
    %50 = arith.cmpi sgt, %48, %49 : vector<8x1xi32>
    %c0_29 = arith.constant 0 : index
    %c0_30 = arith.constant 0 : index
    %51 = vector.load %arg11[%c0_29, %c0_30] : memref<8x32xf32, #tpu.memory_space<vmem>>, vector<8x32xf32>
    %52 = vector.shape_cast %50 : vector<8x1xi1> to vector<8x1xi1>
    %53 = vector.broadcast %52 : vector<8x1xi1> to vector<8x32xi1>
    %54 = arith.select %53, %47, %51 : vector<8x32xi1>, vector<8x32xf32>
    %c0_31 = arith.constant 0 : index
    %c0_32 = arith.constant 0 : index
    %55 = vector.load %arg11[%c0_31, %c0_32] : memref<8x32xf32, #tpu.memory_space<vmem>>, vector<8x32xf32>
    tpu.vector_store %arg11[%c0_31, %c0_32], %54 {strides = array<i32>} : memref<8x32xf32, #tpu.memory_space<vmem>>, vector<8x32xf32>,
    %c0_33 = arith.constant 0 : index
    %c0_34 = arith.constant 0 : index
    %56 = vector.load %arg12[%c0_33, %c0_34] : memref<8x32xf32, #tpu.memory_space<vmem>>, vector<8x32xf32>
    %57 = vector.shape_cast %50 : vector<8x1xi1> to vector<8x1xi1>
    %58 = vector.broadcast %57 : vector<8x1xi1> to vector<8x32xi1>
    %59 = arith.select %58, %45, %56 : vector<8x32xi1>, vector<8x32xf32>
    %c0_35 = arith.constant 0 : index
    %c0_36 = arith.constant 0 : index
    %60 = vector.load %arg12[%c0_35, %c0_36] : memref<8x32xf32, #tpu.memory_space<vmem>>, vector<8x32xf32>
    tpu.vector_store %arg12[%c0_35, %c0_36], %59 {strides = array<i32>} : memref<8x32xf32, #tpu.memory_space<vmem>>, vector<8x32xf32>,
    %c1_i32 = arith.constant 1 : i32
    %61 = arith.index_cast %c1_i32 : i32 to index
    %c0_37 = arith.constant 0 : index
    %c0_38 = arith.constant 0 : index
    %62 = vector.load %arg13[%61, %c0_37, %c0_38] : memref<8x8x128xf32, #tpu.memory_space<vmem>>, vector<1x8x128xf32>
    %63 = vector.shape_cast %62 : vector<1x8x128xf32> to vector<8x128xf32>
    %c0_39 = arith.constant 0 : index
    %c0_40 = arith.constant 0 : index
    %64 = vector.load %arg11[%c0_39, %c0_40] : memref<8x32xf32, #tpu.memory_space<vmem>>, vector<8x32xf32>
    %65 = arith.truncf %64 : vector<8x32xf32> to vector<8x32xbf16>
    %c0_41 = arith.constant 0 : index
    %c0_42 = arith.constant 0 : index
    %66 = vector.load %arg4[%c0_41, %c0_42] : memref<32x128xbf16, #tpu.memory_space<vmem>>, vector<32x128xbf16>
    %cst_43 = arith.constant dense<0.000000e+00> : vector<8x128xf32>
    %67 = tpu.matmul %65, %66, %cst_43 {dimension_numbers = #tpu.dot_dimension_numbers<[1], [0], [0], [1], [0, 0, 1, 1], [], []>} : vector<8x32xbf16>, vector<32x128xbf16>, vector<8x128xf32> -> vector<8x128xf32>
    %68 = arith.addf %63, %67 : vector<8x128xf32>
    %69 = vector.extract_strided_slice %68 {offsets = [0, 0], sizes = [8, 32], strides = [1, 1]} : vector<8x128xf32> to vector<8x32xf32>
    %70 = arith.negf %69 : vector<8x32xf32>
    %71 = math.exp %70 : vector<8x32xf32>
    %cst_44 = arith.constant 1.000000e+00 : f32
    %72 = vector.broadcast %cst_44 : f32 to vector<8x32xf32>
    %73 = arith.addf %72, %71 : vector<8x32xf32>
    %74 = arith.divf %72, %73 : vector<8x32xf32>
    %75 = vector.extract_strided_slice %68 {offsets = [0, 32], sizes = [8, 32], strides = [1, 1]} : vector<8x128xf32> to vector<8x32xf32>
    %76 = arith.negf %75 : vector<8x32xf32>
    %77 = math.exp %76 : vector<8x32xf32>
    %cst_45 = arith.constant 1.000000e+00 : f32
    %78 = vector.broadcast %cst_45 : f32 to vector<8x32xf32>
    %79 = arith.addf %78, %77 : vector<8x32xf32>
    %80 = arith.divf %78, %79 : vector<8x32xf32>
    %81 = vector.extract_strided_slice %68 {offsets = [0, 64], sizes = [8, 32], strides = [1, 1]} : vector<8x128xf32> to vector<8x32xf32>
    %82 = math.tanh %81 : vector<8x32xf32>
    %83 = vector.extract_strided_slice %68 {offsets = [0, 96], sizes = [8, 32], strides = [1, 1]} : vector<8x128xf32> to vector<8x32xf32>
    %84 = arith.negf %83 : vector<8x32xf32>
    %85 = math.exp %84 : vector<8x32xf32>
    %cst_46 = arith.constant 1.000000e+00 : f32
    %86 = vector.broadcast %cst_46 : f32 to vector<8x32xf32>
    %87 = arith.addf %86, %85 : vector<8x32xf32>
    %88 = arith.divf %86, %87 : vector<8x32xf32>
    %c0_47 = arith.constant 0 : index
    %c0_48 = arith.constant 0 : index
    %89 = vector.load %arg12[%c0_47, %c0_48] : memref<8x32xf32, #tpu.memory_space<vmem>>, vector<8x32xf32>
    %90 = arith.mulf %80, %89 : vector<8x32xf32>
    %91 = arith.mulf %74, %82 : vector<8x32xf32>
    %92 = arith.addf %90, %91 : vector<8x32xf32>
    %93 = math.tanh %92 : vector<8x32xf32>
    %94 = arith.mulf %88, %93 : vector<8x32xf32>
    %c0_49 = arith.constant 0 : index
    %c0_50 = arith.constant 0 : index
    %95 = vector.load %arg2[%c0_49, %c0_50] : memref<8x1xi32, #tpu.memory_space<vmem>>, vector<8x1xi32>
    %96 = vector.broadcast %c1_i32 : i32 to vector<8x1xi32>
    %97 = arith.cmpi sgt, %95, %96 : vector<8x1xi32>
    %c0_51 = arith.constant 0 : index
    %c0_52 = arith.constant 0 : index
    %98 = vector.load %arg11[%c0_51, %c0_52] : memref<8x32xf32, #tpu.memory_space<vmem>>, vector<8x32xf32>
    %99 = vector.shape_cast %97 : vector<8x1xi1> to vector<8x1xi1>
    %100 = vector.broadcast %99 : vector<8x1xi1> to vector<8x32xi1>
    %101 = arith.select %100, %94, %98 : vector<8x32xi1>, vector<8x32xf32>
    %c0_53 = arith.constant 0 : index
    %c0_54 = arith.constant 0 : index
    %102 = vector.load %arg11[%c0_53, %c0_54] : memref<8x32xf32, #tpu.memory_space<vmem>>, vector<8x32xf32>
    tpu.vector_store %arg11[%c0_53, %c0_54], %101 {strides = array<i32>} : memref<8x32xf32, #tpu.memory_space<vmem>>, vector<8x32xf32>,
    %c0_55 = arith.constant 0 : index
    %c0_56 = arith.constant 0 : index
    %103 = vector.load %arg12[%c0_55, %c0_56] : memref<8x32xf32, #tpu.memory_space<vmem>>, vector<8x32xf32>
    %104 = vector.shape_cast %97 : vector<8x1xi1> to vector<8x1xi1>
    %105 = vector.broadcast %104 : vector<8x1xi1> to vector<8x32xi1>
    %106 = arith.select %105, %92, %103 : vector<8x32xi1>, vector<8x32xf32>
    %c0_57 = arith.constant 0 : index
    %c0_58 = arith.constant 0 : index
    %107 = vector.load %arg12[%c0_57, %c0_58] : memref<8x32xf32, #tpu.memory_space<vmem>>, vector<8x32xf32>
    tpu.vector_store %arg12[%c0_57, %c0_58], %106 {strides = array<i32>} : memref<8x32xf32, #tpu.memory_space<vmem>>, vector<8x32xf32>,
    %c2_i32 = arith.constant 2 : i32
    %108 = arith.index_cast %c2_i32 : i32 to index
    %c0_59 = arith.constant 0 : index
    %c0_60 = arith.constant 0 : index
    %109 = vector.load %arg13[%108, %c0_59, %c0_60] : memref<8x8x128xf32, #tpu.memory_space<vmem>>, vector<1x8x128xf32>
    %110 = vector.shape_cast %109 : vector<1x8x128xf32> to vector<8x128xf32>
    %c0_61 = arith.constant 0 : index
    %c0_62 = arith.constant 0 : index
    %111 = vector.load %arg11[%c0_61, %c0_62] : memref<8x32xf32, #tpu.memory_space<vmem>>, vector<8x32xf32>
    %112 = arith.truncf %111 : vector<8x32xf32> to vector<8x32xbf16>
    %c0_63 = arith.constant 0 : index
    %c0_64 = arith.constant 0 : index
    %113 = vector.load %arg4[%c0_63, %c0_64] : memref<32x128xbf16, #tpu.memory_space<vmem>>, vector<32x128xbf16>
    %cst_65 = arith.constant dense<0.000000e+00> : vector<8x128xf32>
    %114 = tpu.matmul %112, %113, %cst_65 {dimension_numbers = #tpu.dot_dimension_numbers<[1], [0], [0], [1], [0, 0, 1, 1], [], []>} : vector<8x32xbf16>, vector<32x128xbf16>, vector<8x128xf32> -> vector<8x128xf32>
    %115 = arith.addf %110, %114 : vector<8x128xf32>
    %116 = vector.extract_strided_slice %115 {offsets = [0, 0], sizes = [8, 32], strides = [1, 1]} : vector<8x128xf32> to vector<8x32xf32>
    %117 = arith.negf %116 : vector<8x32xf32>
    %118 = math.exp %117 : vector<8x32xf32>
    %cst_66 = arith.constant 1.000000e+00 : f32
    %119 = vector.broadcast %cst_66 : f32 to vector<8x32xf32>
    %120 = arith.addf %119, %118 : vector<8x32xf32>
    %121 = arith.divf %119, %120 : vector<8x32xf32>
    %122 = vector.extract_strided_slice %115 {offsets = [0, 32], sizes = [8, 32], strides = [1, 1]} : vector<8x128xf32> to vector<8x32xf32>
    %123 = arith.negf %122 : vector<8x32xf32>
    %124 = math.exp %123 : vector<8x32xf32>
    %cst_67 = arith.constant 1.000000e+00 : f32
    %125 = vector.broadcast %cst_67 : f32 to vector<8x32xf32>
    %126 = arith.addf %125, %124 : vector<8x32xf32>
    %127 = arith.divf %125, %126 : vector<8x32xf32>
    %128 = vector.extract_strided_slice %115 {offsets = [0, 64], sizes = [8, 32], strides = [1, 1]} : vector<8x128xf32> to vector<8x32xf32>
    %129 = math.tanh %128 : vector<8x32xf32>
    %130 = vector.extract_strided_slice %115 {offsets = [0, 96], sizes = [8, 32], strides = [1, 1]} : vector<8x128xf32> to vector<8x32xf32>
    %131 = arith.negf %130 : vector<8x32xf32>
    %132 = math.exp %131 : vector<8x32xf32>
    %cst_68 = arith.constant 1.000000e+00 : f32
    %133 = vector.broadcast %cst_68 : f32 to vector<8x32xf32>
    %134 = arith.addf %133, %132 : vector<8x32xf32>
    %135 = arith.divf %133, %134 : vector<8x32xf32>
    %c0_69 = arith.constant 0 : index
    %c0_70 = arith.constant 0 : index
    %136 = vector.load %arg12[%c0_69, %c0_70] : memref<8x32xf32, #tpu.memory_space<vmem>>, vector<8x32xf32>
    %137 = arith.mulf %127, %136 : vector<8x32xf32>
    %138 = arith.mulf %121, %129 : vector<8x32xf32>
    %139 = arith.addf %137, %138 : vector<8x32xf32>
    %140 = math.tanh %139 : vector<8x32xf32>
    %141 = arith.mulf %135, %140 : vector<8x32xf32>
    %c0_71 = arith.constant 0 : index
    %c0_72 = arith.constant 0 : index
    %142 = vector.load %arg2[%c0_71, %c0_72] : memref<8x1xi32, #tpu.memory_space<vmem>>, vector<8x1xi32>
    %143 = vector.broadcast %c2_i32 : i32 to vector<8x1xi32>
    %144 = arith.cmpi sgt, %142, %143 : vector<8x1xi32>
    %c0_73 = arith.constant 0 : index
    %c0_74 = arith.constant 0 : index
    %145 = vector.load %arg11[%c0_73, %c0_74] : memref<8x32xf32, #tpu.memory_space<vmem>>, vector<8x32xf32>
    %146 = vector.shape_cast %144 : vector<8x1xi1> to vector<8x1xi1>
    %147 = vector.broadcast %146 : vector<8x1xi1> to vector<8x32xi1>
    %148 = arith.select %147, %141, %145 : vector<8x32xi1>, vector<8x32xf32>
    %c0_75 = arith.constant 0 : index
    %c0_76 = arith.constant 0 : index
    %149 = vector.load %arg11[%c0_75, %c0_76] : memref<8x32xf32, #tpu.memory_space<vmem>>, vector<8x32xf32>
    tpu.vector_store %arg11[%c0_75, %c0_76], %148 {strides = array<i32>} : memref<8x32xf32, #tpu.memory_space<vmem>>, vector<8x32xf32>,
    %c0_77 = arith.constant 0 : index
    %c0_78 = arith.constant 0 : index
    %150 = vector.load %arg12[%c0_77, %c0_78] : memref<8x32xf32, #tpu.memory_space<vmem>>, vector<8x32xf32>
    %151 = vector.shape_cast %144 : vector<8x1xi1> to vector<8x1xi1>
    %152 = vector.broadcast %151 : vector<8x1xi1> to vector<8x32xi1>
    %153 = arith.select %152, %139, %150 : vector<8x32xi1>, vector<8x32xf32>
    %c0_79 = arith.constant 0 : index
    %c0_80 = arith.constant 0 : index
    %154 = vector.load %arg12[%c0_79, %c0_80] : memref<8x32xf32, #tpu.memory_space<vmem>>, vector<8x32xf32>
    tpu.vector_store %arg12[%c0_79, %c0_80], %153 {strides = array<i32>} : memref<8x32xf32, #tpu.memory_space<vmem>>, vector<8x32xf32>,
    %c3_i32 = arith.constant 3 : i32
    %155 = arith.index_cast %c3_i32 : i32 to index
    %c0_81 = arith.constant 0 : index
    %c0_82 = arith.constant 0 : index
    %156 = vector.load %arg13[%155, %c0_81, %c0_82] : memref<8x8x128xf32, #tpu.memory_space<vmem>>, vector<1x8x128xf32>
    %157 = vector.shape_cast %156 : vector<1x8x128xf32> to vector<8x128xf32>
    %c0_83 = arith.constant 0 : index
    %c0_84 = arith.constant 0 : index
    %158 = vector.load %arg11[%c0_83, %c0_84] : memref<8x32xf32, #tpu.memory_space<vmem>>, vector<8x32xf32>
    %159 = arith.truncf %158 : vector<8x32xf32> to vector<8x32xbf16>
    %c0_85 = arith.constant 0 : index
    %c0_86 = arith.constant 0 : index
    %160 = vector.load %arg4[%c0_85, %c0_86] : memref<32x128xbf16, #tpu.memory_space<vmem>>, vector<32x128xbf16>
    %cst_87 = arith.constant dense<0.000000e+00> : vector<8x128xf32>
    %161 = tpu.matmul %159, %160, %cst_87 {dimension_numbers = #tpu.dot_dimension_numbers<[1], [0], [0], [1], [0, 0, 1, 1], [], []>} : vector<8x32xbf16>, vector<32x128xbf16>, vector<8x128xf32> -> vector<8x128xf32>
    %162 = arith.addf %157, %161 : vector<8x128xf32>
    %163 = vector.extract_strided_slice %162 {offsets = [0, 0], sizes = [8, 32], strides = [1, 1]} : vector<8x128xf32> to vector<8x32xf32>
    %164 = arith.negf %163 : vector<8x32xf32>
    %165 = math.exp %164 : vector<8x32xf32>
    %cst_88 = arith.constant 1.000000e+00 : f32
    %166 = vector.broadcast %cst_88 : f32 to vector<8x32xf32>
    %167 = arith.addf %166, %165 : vector<8x32xf32>
    %168 = arith.divf %166, %167 : vector<8x32xf32>
    %169 = vector.extract_strided_slice %162 {offsets = [0, 32], sizes = [8, 32], strides = [1, 1]} : vector<8x128xf32> to vector<8x32xf32>
    %170 = arith.negf %169 : vector<8x32xf32>
    %171 = math.exp %170 : vector<8x32xf32>
    %cst_89 = arith.constant 1.000000e+00 : f32
    %172 = vector.broadcast %cst_89 : f32 to vector<8x32xf32>
    %173 = arith.addf %172, %171 : vector<8x32xf32>
    %174 = arith.divf %172, %173 : vector<8x32xf32>
    %175 = vector.extract_strided_slice %162 {offsets = [0, 64], sizes = [8, 32], strides = [1, 1]} : vector<8x128xf32> to vector<8x32xf32>
    %176 = math.tanh %175 : vector<8x32xf32>
    %177 = vector.extract_strided_slice %162 {offsets = [0, 96], sizes = [8, 32], strides = [1, 1]} : vector<8x128xf32> to vector<8x32xf32>
    %178 = arith.negf %177 : vector<8x32xf32>
    %179 = math.exp %178 : vector<8x32xf32>
    %cst_90 = arith.constant 1.000000e+00 : f32
    %180 = vector.broadcast %cst_90 : f32 to vector<8x32xf32>
    %181 = arith.addf %180, %179 : vector<8x32xf32>
    %182 = arith.divf %180, %181 : vector<8x32xf32>
    %c0_91 = arith.constant 0 : index
    %c0_92 = arith.constant 0 : index
    %183 = vector.load %arg12[%c0_91, %c0_92] : memref<8x32xf32, #tpu.memory_space<vmem>>, vector<8x32xf32>
    %184 = arith.mulf %174, %183 : vector<8x32xf32>
    %185 = arith.mulf %168, %176 : vector<8x32xf32>
    %186 = arith.addf %184, %185 : vector<8x32xf32>
    %187 = math.tanh %186 : vector<8x32xf32>
    %188 = arith.mulf %182, %187 : vector<8x32xf32>
    %c0_93 = arith.constant 0 : index
    %c0_94 = arith.constant 0 : index
    %189 = vector.load %arg2[%c0_93, %c0_94] : memref<8x1xi32, #tpu.memory_space<vmem>>, vector<8x1xi32>
    %190 = vector.broadcast %c3_i32 : i32 to vector<8x1xi32>
    %191 = arith.cmpi sgt, %189, %190 : vector<8x1xi32>
    %c0_95 = arith.constant 0 : index
    %c0_96 = arith.constant 0 : index
    %192 = vector.load %arg11[%c0_95, %c0_96] : memref<8x32xf32, #tpu.memory_space<vmem>>, vector<8x32xf32>
    %193 = vector.shape_cast %191 : vector<8x1xi1> to vector<8x1xi1>
    %194 = vector.broadcast %193 : vector<8x1xi1> to vector<8x32xi1>
    %195 = arith.select %194, %188, %192 : vector<8x32xi1>, vector<8x32xf32>
    %c0_97 = arith.constant 0 : index
    %c0_98 = arith.constant 0 : index
    %196 = vector.load %arg11[%c0_97, %c0_98] : memref<8x32xf32, #tpu.memory_space<vmem>>, vector<8x32xf32>
    tpu.vector_store %arg11[%c0_97, %c0_98], %195 {strides = array<i32>} : memref<8x32xf32, #tpu.memory_space<vmem>>, vector<8x32xf32>,
    %c0_99 = arith.constant 0 : index
    %c0_100 = arith.constant 0 : index
    %197 = vector.load %arg12[%c0_99, %c0_100] : memref<8x32xf32, #tpu.memory_space<vmem>>, vector<8x32xf32>
    %198 = vector.shape_cast %191 : vector<8x1xi1> to vector<8x1xi1>
    %199 = vector.broadcast %198 : vector<8x1xi1> to vector<8x32xi1>
    %200 = arith.select %199, %186, %197 : vector<8x32xi1>, vector<8x32xf32>
    %c0_101 = arith.constant 0 : index
    %c0_102 = arith.constant 0 : index
    %201 = vector.load %arg12[%c0_101, %c0_102] : memref<8x32xf32, #tpu.memory_space<vmem>>, vector<8x32xf32>
    tpu.vector_store %arg12[%c0_101, %c0_102], %200 {strides = array<i32>} : memref<8x32xf32, #tpu.memory_space<vmem>>, vector<8x32xf32>,
    %c4_i32 = arith.constant 4 : i32
    %202 = arith.index_cast %c4_i32 : i32 to index
    %c0_103 = arith.constant 0 : index
    %c0_104 = arith.constant 0 : index
    %203 = vector.load %arg13[%202, %c0_103, %c0_104] : memref<8x8x128xf32, #tpu.memory_space<vmem>>, vector<1x8x128xf32>
    %204 = vector.shape_cast %203 : vector<1x8x128xf32> to vector<8x128xf32>
    %c0_105 = arith.constant 0 : index
    %c0_106 = arith.constant 0 : index
    %205 = vector.load %arg11[%c0_105, %c0_106] : memref<8x32xf32, #tpu.memory_space<vmem>>, vector<8x32xf32>
    %206 = arith.truncf %205 : vector<8x32xf32> to vector<8x32xbf16>
    %c0_107 = arith.constant 0 : index
    %c0_108 = arith.constant 0 : index
    %207 = vector.load %arg4[%c0_107, %c0_108] : memref<32x128xbf16, #tpu.memory_space<vmem>>, vector<32x128xbf16>
    %cst_109 = arith.constant dense<0.000000e+00> : vector<8x128xf32>
    %208 = tpu.matmul %206, %207, %cst_109 {dimension_numbers = #tpu.dot_dimension_numbers<[1], [0], [0], [1], [0, 0, 1, 1], [], []>} : vector<8x32xbf16>, vector<32x128xbf16>, vector<8x128xf32> -> vector<8x128xf32>
    %209 = arith.addf %204, %208 : vector<8x128xf32>
    %210 = vector.extract_strided_slice %209 {offsets = [0, 0], sizes = [8, 32], strides = [1, 1]} : vector<8x128xf32> to vector<8x32xf32>
    %211 = arith.negf %210 : vector<8x32xf32>
    %212 = math.exp %211 : vector<8x32xf32>
    %cst_110 = arith.constant 1.000000e+00 : f32
    %213 = vector.broadcast %cst_110 : f32 to vector<8x32xf32>
    %214 = arith.addf %213, %212 : vector<8x32xf32>
    %215 = arith.divf %213, %214 : vector<8x32xf32>
    %216 = vector.extract_strided_slice %209 {offsets = [0, 32], sizes = [8, 32], strides = [1, 1]} : vector<8x128xf32> to vector<8x32xf32>
    %217 = arith.negf %216 : vector<8x32xf32>
    %218 = math.exp %217 : vector<8x32xf32>
    %cst_111 = arith.constant 1.000000e+00 : f32
    %219 = vector.broadcast %cst_111 : f32 to vector<8x32xf32>
    %220 = arith.addf %219, %218 : vector<8x32xf32>
    %221 = arith.divf %219, %220 : vector<8x32xf32>
    %222 = vector.extract_strided_slice %209 {offsets = [0, 64], sizes = [8, 32], strides = [1, 1]} : vector<8x128xf32> to vector<8x32xf32>
    %223 = math.tanh %222 : vector<8x32xf32>
    %224 = vector.extract_strided_slice %209 {offsets = [0, 96], sizes = [8, 32], strides = [1, 1]} : vector<8x128xf32> to vector<8x32xf32>
    %225 = arith.negf %224 : vector<8x32xf32>
    %226 = math.exp %225 : vector<8x32xf32>
    %cst_112 = arith.constant 1.000000e+00 : f32
    %227 = vector.broadcast %cst_112 : f32 to vector<8x32xf32>
    %228 = arith.addf %227, %226 : vector<8x32xf32>
    %229 = arith.divf %227, %228 : vector<8x32xf32>
    %c0_113 = arith.constant 0 : index
    %c0_114 = arith.constant 0 : index
    %230 = vector.load %arg12[%c0_113, %c0_114] : memref<8x32xf32, #tpu.memory_space<vmem>>, vector<8x32xf32>
    %231 = arith.mulf %221, %230 : vector<8x32xf32>
    %232 = arith.mulf %215, %223 : vector<8x32xf32>
    %233 = arith.addf %231, %232 : vector<8x32xf32>
    %234 = math.tanh %233 : vector<8x32xf32>
    %235 = arith.mulf %229, %234 : vector<8x32xf32>
    %c0_115 = arith.constant 0 : index
    %c0_116 = arith.constant 0 : index
    %236 = vector.load %arg2[%c0_115, %c0_116] : memref<8x1xi32, #tpu.memory_space<vmem>>, vector<8x1xi32>
    %237 = vector.broadcast %c4_i32 : i32 to vector<8x1xi32>
    %238 = arith.cmpi sgt, %236, %237 : vector<8x1xi32>
    %c0_117 = arith.constant 0 : index
    %c0_118 = arith.constant 0 : index
    %239 = vector.load %arg11[%c0_117, %c0_118] : memref<8x32xf32, #tpu.memory_space<vmem>>, vector<8x32xf32>
    %240 = vector.shape_cast %238 : vector<8x1xi1> to vector<8x1xi1>
    %241 = vector.broadcast %240 : vector<8x1xi1> to vector<8x32xi1>
    %242 = arith.select %241, %235, %239 : vector<8x32xi1>, vector<8x32xf32>
    %c0_119 = arith.constant 0 : index
    %c0_120 = arith.constant 0 : index
    %243 = vector.load %arg11[%c0_119, %c0_120] : memref<8x32xf32, #tpu.memory_space<vmem>>, vector<8x32xf32>
    tpu.vector_store %arg11[%c0_119, %c0_120], %242 {strides = array<i32>} : memref<8x32xf32, #tpu.memory_space<vmem>>, vector<8x32xf32>,
    %c0_121 = arith.constant 0 : index
    %c0_122 = arith.constant 0 : index
    %244 = vector.load %arg12[%c0_121, %c0_122] : memref<8x32xf32, #tpu.memory_space<vmem>>, vector<8x32xf32>
    %245 = vector.shape_cast %238 : vector<8x1xi1> to vector<8x1xi1>
    %246 = vector.broadcast %245 : vector<8x1xi1> to vector<8x32xi1>
    %247 = arith.select %246, %233, %244 : vector<8x32xi1>, vector<8x32xf32>
    %c0_123 = arith.constant 0 : index
    %c0_124 = arith.constant 0 : index
    %248 = vector.load %arg12[%c0_123, %c0_124] : memref<8x32xf32, #tpu.memory_space<vmem>>, vector<8x32xf32>
    tpu.vector_store %arg12[%c0_123, %c0_124], %247 {strides = array<i32>} : memref<8x32xf32, #tpu.memory_space<vmem>>, vector<8x32xf32>,
    %c5_i32 = arith.constant 5 : i32
    %249 = arith.index_cast %c5_i32 : i32 to index
    %c0_125 = arith.constant 0 : index
    %c0_126 = arith.constant 0 : index
    %250 = vector.load %arg13[%249, %c0_125, %c0_126] : memref<8x8x128xf32, #tpu.memory_space<vmem>>, vector<1x8x128xf32>
    %251 = vector.shape_cast %250 : vector<1x8x128xf32> to vector<8x128xf32>
    %c0_127 = arith.constant 0 : index
    %c0_128 = arith.constant 0 : index
    %252 = vector.load %arg11[%c0_127, %c0_128] : memref<8x32xf32, #tpu.memory_space<vmem>>, vector<8x32xf32>
    %253 = arith.truncf %252 : vector<8x32xf32> to vector<8x32xbf16>
    %c0_129 = arith.constant 0 : index
    %c0_130 = arith.constant 0 : index
    %254 = vector.load %arg4[%c0_129, %c0_130] : memref<32x128xbf16, #tpu.memory_space<vmem>>, vector<32x128xbf16>
    %cst_131 = arith.constant dense<0.000000e+00> : vector<8x128xf32>
    %255 = tpu.matmul %253, %254, %cst_131 {dimension_numbers = #tpu.dot_dimension_numbers<[1], [0], [0], [1], [0, 0, 1, 1], [], []>} : vector<8x32xbf16>, vector<32x128xbf16>, vector<8x128xf32> -> vector<8x128xf32>
    %256 = arith.addf %251, %255 : vector<8x128xf32>
    %257 = vector.extract_strided_slice %256 {offsets = [0, 0], sizes = [8, 32], strides = [1, 1]} : vector<8x128xf32> to vector<8x32xf32>
    %258 = arith.negf %257 : vector<8x32xf32>
    %259 = math.exp %258 : vector<8x32xf32>
    %cst_132 = arith.constant 1.000000e+00 : f32
    %260 = vector.broadcast %cst_132 : f32 to vector<8x32xf32>
    %261 = arith.addf %260, %259 : vector<8x32xf32>
    %262 = arith.divf %260, %261 : vector<8x32xf32>
    %263 = vector.extract_strided_slice %256 {offsets = [0, 32], sizes = [8, 32], strides = [1, 1]} : vector<8x128xf32> to vector<8x32xf32>
    %264 = arith.negf %263 : vector<8x32xf32>
    %265 = math.exp %264 : vector<8x32xf32>
    %cst_133 = arith.constant 1.000000e+00 : f32
    %266 = vector.broadcast %cst_133 : f32 to vector<8x32xf32>
    %267 = arith.addf %266, %265 : vector<8x32xf32>
    %268 = arith.divf %266, %267 : vector<8x32xf32>
    %269 = vector.extract_strided_slice %256 {offsets = [0, 64], sizes = [8, 32], strides = [1, 1]} : vector<8x128xf32> to vector<8x32xf32>
    %270 = math.tanh %269 : vector<8x32xf32>
    %271 = vector.extract_strided_slice %256 {offsets = [0, 96], sizes = [8, 32], strides = [1, 1]} : vector<8x128xf32> to vector<8x32xf32>
    %272 = arith.negf %271 : vector<8x32xf32>
    %273 = math.exp %272 : vector<8x32xf32>
    %cst_134 = arith.constant 1.000000e+00 : f32
    %274 = vector.broadcast %cst_134 : f32 to vector<8x32xf32>
    %275 = arith.addf %274, %273 : vector<8x32xf32>
    %276 = arith.divf %274, %275 : vector<8x32xf32>
    %c0_135 = arith.constant 0 : index
    %c0_136 = arith.constant 0 : index
    %277 = vector.load %arg12[%c0_135, %c0_136] : memref<8x32xf32, #tpu.memory_space<vmem>>, vector<8x32xf32>
    %278 = arith.mulf %268, %277 : vector<8x32xf32>
    %279 = arith.mulf %262, %270 : vector<8x32xf32>
    %280 = arith.addf %278, %279 : vector<8x32xf32>
    %281 = math.tanh %280 : vector<8x32xf32>
    %282 = arith.mulf %276, %281 : vector<8x32xf32>
    %c0_137 = arith.constant 0 : index
    %c0_138 = arith.constant 0 : index
    %283 = vector.load %arg2[%c0_137, %c0_138] : memref<8x1xi32, #tpu.memory_space<vmem>>, vector<8x1xi32>
    %284 = vector.broadcast %c5_i32 : i32 to vector<8x1xi32>
    %285 = arith.cmpi sgt, %283, %284 : vector<8x1xi32>
    %c0_139 = arith.constant 0 : index
    %c0_140 = arith.constant 0 : index
    %286 = vector.load %arg11[%c0_139, %c0_140] : memref<8x32xf32, #tpu.memory_space<vmem>>, vector<8x32xf32>
    %287 = vector.shape_cast %285 : vector<8x1xi1> to vector<8x1xi1>
    %288 = vector.broadcast %287 : vector<8x1xi1> to vector<8x32xi1>
    %289 = arith.select %288, %282, %286 : vector<8x32xi1>, vector<8x32xf32>
    %c0_141 = arith.constant 0 : index
    %c0_142 = arith.constant 0 : index
    %290 = vector.load %arg11[%c0_141, %c0_142] : memref<8x32xf32, #tpu.memory_space<vmem>>, vector<8x32xf32>
    tpu.vector_store %arg11[%c0_141, %c0_142], %289 {strides = array<i32>} : memref<8x32xf32, #tpu.memory_space<vmem>>, vector<8x32xf32>,
    %c0_143 = arith.constant 0 : index
    %c0_144 = arith.constant 0 : index
    %291 = vector.load %arg12[%c0_143, %c0_144] : memref<8x32xf32, #tpu.memory_space<vmem>>, vector<8x32xf32>
    %292 = vector.shape_cast %285 : vector<8x1xi1> to vector<8x1xi1>
    %293 = vector.broadcast %292 : vector<8x1xi1> to vector<8x32xi1>
    %294 = arith.select %293, %280, %291 : vector<8x32xi1>, vector<8x32xf32>
    %c0_145 = arith.constant 0 : index
    %c0_146 = arith.constant 0 : index
    %295 = vector.load %arg12[%c0_145, %c0_146] : memref<8x32xf32, #tpu.memory_space<vmem>>, vector<8x32xf32>
    tpu.vector_store %arg12[%c0_145, %c0_146], %294 {strides = array<i32>} : memref<8x32xf32, #tpu.memory_space<vmem>>, vector<8x32xf32>,
    %c6_i32 = arith.constant 6 : i32
    %296 = arith.index_cast %c6_i32 : i32 to index
    %c0_147 = arith.constant 0 : index
    %c0_148 = arith.constant 0 : index
    %297 = vector.load %arg13[%296, %c0_147, %c0_148] : memref<8x8x128xf32, #tpu.memory_space<vmem>>, vector<1x8x128xf32>
    %298 = vector.shape_cast %297 : vector<1x8x128xf32> to vector<8x128xf32>
    %c0_149 = arith.constant 0 : index
    %c0_150 = arith.constant 0 : index
    %299 = vector.load %arg11[%c0_149, %c0_150] : memref<8x32xf32, #tpu.memory_space<vmem>>, vector<8x32xf32>
    %300 = arith.truncf %299 : vector<8x32xf32> to vector<8x32xbf16>
    %c0_151 = arith.constant 0 : index
    %c0_152 = arith.constant 0 : index
    %301 = vector.load %arg4[%c0_151, %c0_152] : memref<32x128xbf16, #tpu.memory_space<vmem>>, vector<32x128xbf16>
    %cst_153 = arith.constant dense<0.000000e+00> : vector<8x128xf32>
    %302 = tpu.matmul %300, %301, %cst_153 {dimension_numbers = #tpu.dot_dimension_numbers<[1], [0], [0], [1], [0, 0, 1, 1], [], []>} : vector<8x32xbf16>, vector<32x128xbf16>, vector<8x128xf32> -> vector<8x128xf32>
    %303 = arith.addf %298, %302 : vector<8x128xf32>
    %304 = vector.extract_strided_slice %303 {offsets = [0, 0], sizes = [8, 32], strides = [1, 1]} : vector<8x128xf32> to vector<8x32xf32>
    %305 = arith.negf %304 : vector<8x32xf32>
    %306 = math.exp %305 : vector<8x32xf32>
    %cst_154 = arith.constant 1.000000e+00 : f32
    %307 = vector.broadcast %cst_154 : f32 to vector<8x32xf32>
    %308 = arith.addf %307, %306 : vector<8x32xf32>
    %309 = arith.divf %307, %308 : vector<8x32xf32>
    %310 = vector.extract_strided_slice %303 {offsets = [0, 32], sizes = [8, 32], strides = [1, 1]} : vector<8x128xf32> to vector<8x32xf32>
    %311 = arith.negf %310 : vector<8x32xf32>
    %312 = math.exp %311 : vector<8x32xf32>
    %cst_155 = arith.constant 1.000000e+00 : f32
    %313 = vector.broadcast %cst_155 : f32 to vector<8x32xf32>
    %314 = arith.addf %313, %312 : vector<8x32xf32>
    %315 = arith.divf %313, %314 : vector<8x32xf32>
    %316 = vector.extract_strided_slice %303 {offsets = [0, 64], sizes = [8, 32], strides = [1, 1]} : vector<8x128xf32> to vector<8x32xf32>
    %317 = math.tanh %316 : vector<8x32xf32>
    %318 = vector.extract_strided_slice %303 {offsets = [0, 96], sizes = [8, 32], strides = [1, 1]} : vector<8x128xf32> to vector<8x32xf32>
    %319 = arith.negf %318 : vector<8x32xf32>
    %320 = math.exp %319 : vector<8x32xf32>
    %cst_156 = arith.constant 1.000000e+00 : f32
    %321 = vector.broadcast %cst_156 : f32 to vector<8x32xf32>
    %322 = arith.addf %321, %320 : vector<8x32xf32>
    %323 = arith.divf %321, %322 : vector<8x32xf32>
    %c0_157 = arith.constant 0 : index
    %c0_158 = arith.constant 0 : index
    %324 = vector.load %arg12[%c0_157, %c0_158] : memref<8x32xf32, #tpu.memory_space<vmem>>, vector<8x32xf32>
    %325 = arith.mulf %315, %324 : vector<8x32xf32>
    %326 = arith.mulf %309, %317 : vector<8x32xf32>
    %327 = arith.addf %325, %326 : vector<8x32xf32>
    %328 = math.tanh %327 : vector<8x32xf32>
    %329 = arith.mulf %323, %328 : vector<8x32xf32>
    %c0_159 = arith.constant 0 : index
    %c0_160 = arith.constant 0 : index
    %330 = vector.load %arg2[%c0_159, %c0_160] : memref<8x1xi32, #tpu.memory_space<vmem>>, vector<8x1xi32>
    %331 = vector.broadcast %c6_i32 : i32 to vector<8x1xi32>
    %332 = arith.cmpi sgt, %330, %331 : vector<8x1xi32>
    %c0_161 = arith.constant 0 : index
    %c0_162 = arith.constant 0 : index
    %333 = vector.load %arg11[%c0_161, %c0_162] : memref<8x32xf32, #tpu.memory_space<vmem>>, vector<8x32xf32>
    %334 = vector.shape_cast %332 : vector<8x1xi1> to vector<8x1xi1>
    %335 = vector.broadcast %334 : vector<8x1xi1> to vector<8x32xi1>
    %336 = arith.select %335, %329, %333 : vector<8x32xi1>, vector<8x32xf32>
    %c0_163 = arith.constant 0 : index
    %c0_164 = arith.constant 0 : index
    %337 = vector.load %arg11[%c0_163, %c0_164] : memref<8x32xf32, #tpu.memory_space<vmem>>, vector<8x32xf32>
    tpu.vector_store %arg11[%c0_163, %c0_164], %336 {strides = array<i32>} : memref<8x32xf32, #tpu.memory_space<vmem>>, vector<8x32xf32>,
    %c0_165 = arith.constant 0 : index
    %c0_166 = arith.constant 0 : index
    %338 = vector.load %arg12[%c0_165, %c0_166] : memref<8x32xf32, #tpu.memory_space<vmem>>, vector<8x32xf32>
    %339 = vector.shape_cast %332 : vector<8x1xi1> to vector<8x1xi1>
    %340 = vector.broadcast %339 : vector<8x1xi1> to vector<8x32xi1>
    %341 = arith.select %340, %327, %338 : vector<8x32xi1>, vector<8x32xf32>
    %c0_167 = arith.constant 0 : index
    %c0_168 = arith.constant 0 : index
    %342 = vector.load %arg12[%c0_167, %c0_168] : memref<8x32xf32, #tpu.memory_space<vmem>>, vector<8x32xf32>
    tpu.vector_store %arg12[%c0_167, %c0_168], %341 {strides = array<i32>} : memref<8x32xf32, #tpu.memory_space<vmem>>, vector<8x32xf32>,
    %c7_i32 = arith.constant 7 : i32
    %343 = arith.index_cast %c7_i32 : i32 to index
    %c0_169 = arith.constant 0 : index
    %c0_170 = arith.constant 0 : index
    %344 = vector.load %arg13[%343, %c0_169, %c0_170] : memref<8x8x128xf32, #tpu.memory_space<vmem>>, vector<1x8x128xf32>
    %345 = vector.shape_cast %344 : vector<1x8x128xf32> to vector<8x128xf32>
    %c0_171 = arith.constant 0 : index
    %c0_172 = arith.constant 0 : index
    %346 = vector.load %arg11[%c0_171, %c0_172] : memref<8x32xf32, #tpu.memory_space<vmem>>, vector<8x32xf32>
    %347 = arith.truncf %346 : vector<8x32xf32> to vector<8x32xbf16>
    %c0_173 = arith.constant 0 : index
    %c0_174 = arith.constant 0 : index
    %348 = vector.load %arg4[%c0_173, %c0_174] : memref<32x128xbf16, #tpu.memory_space<vmem>>, vector<32x128xbf16>
    %cst_175 = arith.constant dense<0.000000e+00> : vector<8x128xf32>
    %349 = tpu.matmul %347, %348, %cst_175 {dimension_numbers = #tpu.dot_dimension_numbers<[1], [0], [0], [1], [0, 0, 1, 1], [], []>} : vector<8x32xbf16>, vector<32x128xbf16>, vector<8x128xf32> -> vector<8x128xf32>
    %350 = arith.addf %345, %349 : vector<8x128xf32>
    %351 = vector.extract_strided_slice %350 {offsets = [0, 0], sizes = [8, 32], strides = [1, 1]} : vector<8x128xf32> to vector<8x32xf32>
    %352 = arith.negf %351 : vector<8x32xf32>
    %353 = math.exp %352 : vector<8x32xf32>
    %cst_176 = arith.constant 1.000000e+00 : f32
    %354 = vector.broadcast %cst_176 : f32 to vector<8x32xf32>
    %355 = arith.addf %354, %353 : vector<8x32xf32>
    %356 = arith.divf %354, %355 : vector<8x32xf32>
    %357 = vector.extract_strided_slice %350 {offsets = [0, 32], sizes = [8, 32], strides = [1, 1]} : vector<8x128xf32> to vector<8x32xf32>
    %358 = arith.negf %357 : vector<8x32xf32>
    %359 = math.exp %358 : vector<8x32xf32>
    %cst_177 = arith.constant 1.000000e+00 : f32
    %360 = vector.broadcast %cst_177 : f32 to vector<8x32xf32>
    %361 = arith.addf %360, %359 : vector<8x32xf32>
    %362 = arith.divf %360, %361 : vector<8x32xf32>
    %363 = vector.extract_strided_slice %350 {offsets = [0, 64], sizes = [8, 32], strides = [1, 1]} : vector<8x128xf32> to vector<8x32xf32>
    %364 = math.tanh %363 : vector<8x32xf32>
    %365 = vector.extract_strided_slice %350 {offsets = [0, 96], sizes = [8, 32], strides = [1, 1]} : vector<8x128xf32> to vector<8x32xf32>
    %366 = arith.negf %365 : vector<8x32xf32>
    %367 = math.exp %366 : vector<8x32xf32>
    %cst_178 = arith.constant 1.000000e+00 : f32
    %368 = vector.broadcast %cst_178 : f32 to vector<8x32xf32>
    %369 = arith.addf %368, %367 : vector<8x32xf32>
    %370 = arith.divf %368, %369 : vector<8x32xf32>
    %c0_179 = arith.constant 0 : index
    %c0_180 = arith.constant 0 : index
    %371 = vector.load %arg12[%c0_179, %c0_180] : memref<8x32xf32, #tpu.memory_space<vmem>>, vector<8x32xf32>
    %372 = arith.mulf %362, %371 : vector<8x32xf32>
    %373 = arith.mulf %356, %364 : vector<8x32xf32>
    %374 = arith.addf %372, %373 : vector<8x32xf32>
    %375 = math.tanh %374 : vector<8x32xf32>
    %376 = arith.mulf %370, %375 : vector<8x32xf32>
    %c0_181 = arith.constant 0 : index
    %c0_182 = arith.constant 0 : index
    %377 = vector.load %arg2[%c0_181, %c0_182] : memref<8x1xi32, #tpu.memory_space<vmem>>, vector<8x1xi32>
    %378 = vector.broadcast %c7_i32 : i32 to vector<8x1xi32>
    %379 = arith.cmpi sgt, %377, %378 : vector<8x1xi32>
    %c0_183 = arith.constant 0 : index
    %c0_184 = arith.constant 0 : index
    %380 = vector.load %arg11[%c0_183, %c0_184] : memref<8x32xf32, #tpu.memory_space<vmem>>, vector<8x32xf32>
    %381 = vector.shape_cast %379 : vector<8x1xi1> to vector<8x1xi1>
    %382 = vector.broadcast %381 : vector<8x1xi1> to vector<8x32xi1>
    %383 = arith.select %382, %376, %380 : vector<8x32xi1>, vector<8x32xf32>
    %c0_185 = arith.constant 0 : index
    %c0_186 = arith.constant 0 : index
    %384 = vector.load %arg11[%c0_185, %c0_186] : memref<8x32xf32, #tpu.memory_space<vmem>>, vector<8x32xf32>
    tpu.vector_store %arg11[%c0_185, %c0_186], %383 {strides = array<i32>} : memref<8x32xf32, #tpu.memory_space<vmem>>, vector<8x32xf32>,
    %c0_187 = arith.constant 0 : index
    %c0_188 = arith.constant 0 : index
    %385 = vector.load %arg12[%c0_187, %c0_188] : memref<8x32xf32, #tpu.memory_space<vmem>>, vector<8x32xf32>
    %386 = vector.shape_cast %379 : vector<8x1xi1> to vector<8x1xi1>
    %387 = vector.broadcast %386 : vector<8x1xi1> to vector<8x32xi1>
    %388 = arith.select %387, %374, %385 : vector<8x32xi1>, vector<8x32xf32>
    %c0_189 = arith.constant 0 : index
    %c0_190 = arith.constant 0 : index
    %389 = vector.load %arg12[%c0_189, %c0_190] : memref<8x32xf32, #tpu.memory_space<vmem>>, vector<8x32xf32>
    tpu.vector_store %arg12[%c0_189, %c0_190], %388 {strides = array<i32>} : memref<8x32xf32, #tpu.memory_space<vmem>>, vector<8x32xf32>,
    %c8_i32 = arith.constant 8 : i32
    %c0_191 = arith.constant 0 : index
    %c0_192 = arith.constant 0 : index
    %390 = vector.load %arg11[%c0_191, %c0_192] : memref<8x32xf32, #tpu.memory_space<vmem>>, vector<8x32xf32>
    %c0_193 = arith.constant 0 : index
    %c0_194 = arith.constant 0 : index
    %391 = vector.load %arg6[%c0_193, %c0_194] : memref<32x16xf32, #tpu.memory_space<vmem>>, vector<32x16xf32>
    %cst_195 = arith.constant dense<0.000000e+00> : vector<8x16xf32>
    %392 = tpu.matmul %390, %391, %cst_195 {dimension_numbers = #tpu.dot_dimension_numbers<[1], [0], [0], [1], [0, 0, 1, 1], [], []>} : vector<8x32xf32>, vector<32x16xf32>, vector<8x16xf32> -> vector<8x16xf32>
    %c0_196 = arith.constant 0 : index
    %c0_197 = arith.constant 0 : index
    %393 = vector.load %arg7[%c0_196, %c0_197] : memref<1x16xf32, #tpu.memory_space<vmem>>, vector<1x16xf32>
    %394 = vector.broadcast %393 : vector<1x16xf32> to vector<8x16xf32>
    %395 = arith.addf %392, %394 : vector<8x16xf32>
    %cst_198 = arith.constant 0.000000e+00 : f32
    %396 = vector.broadcast %cst_198 : f32 to vector<8x16xf32>
    %397 = arith.maximumf %395, %396 : vector<8x16xf32>
    %c0_199 = arith.constant 0 : index
    %c0_200 = arith.constant 0 : index
    %398 = vector.load %arg8[%c0_199, %c0_200] : memref<16x1xf32, #tpu.memory_space<vmem>>, vector<16x1xf32>
    %cst_201 = arith.constant dense<0.000000e+00> : vector<8x1xf32>
    %399 = tpu.matmul %397, %398, %cst_201 {dimension_numbers = #tpu.dot_dimension_numbers<[1], [0], [0], [1], [0, 0, 1, 1], [], []>} : vector<8x16xf32>, vector<16x1xf32>, vector<8x1xf32> -> vector<8x1xf32>
    %c0_202 = arith.constant 0 : index
    %c0_203 = arith.constant 0 : index
    %400 = vector.load %arg9[%c0_202, %c0_203] : memref<1x1xf32, #tpu.memory_space<vmem>>, vector<1x1xf32>
    %401 = vector.broadcast %400 : vector<1x1xf32> to vector<8x1xf32>
    %402 = arith.addf %399, %401 : vector<8x1xf32>
    %c0_204 = arith.constant 0 : index
    %c0_205 = arith.constant 0 : index
    %403 = vector.load %arg10[%c0_204, %c0_205] : memref<8x1xf32, #tpu.memory_space<vmem>>, vector<8x1xf32>
    tpu.vector_store %arg10[%c0_204, %c0_205], %402 {strides = array<i32>} : memref<8x1xf32, #tpu.memory_space<vmem>>, vector<8x1xf32>,
    return
  }
  func.func @transform_0(%arg0: i32) -> (i32, i32, i32) {
    %c0_i32 = arith.constant 0 : i32
    %c0_i32_0 = arith.constant 0 : i32
    %c0_i32_1 = arith.constant 0 : i32
    return %c0_i32, %arg0, %c0_i32_0 : i32, i32, i32
  }
  func.func @transform_1(%arg0: i32) -> (i32, i32) {
    %c0_i32 = arith.constant 0 : i32
    %c0_i32_0 = arith.constant 0 : i32
    return %arg0, %c0_i32 : i32, i32
  }
  func.func @transform_2(%arg0: i32) -> (i32, i32) {
    %c0_i32 = arith.constant 0 : i32
    %c0_i32_0 = arith.constant 0 : i32
    %c0_i32_1 = arith.constant 0 : i32
    return %c0_i32, %c0_i32_0 : i32, i32
  }
  func.func @transform_3(%arg0: i32) -> (i32, i32) {
    %c0_i32 = arith.constant 0 : i32
    %c0_i32_0 = arith.constant 0 : i32
    %c0_i32_1 = arith.constant 0 : i32
    return %c0_i32, %c0_i32_0 : i32, i32
  }
  func.func @transform_4(%arg0: i32) -> (i32, i32) {
    %c0_i32 = arith.constant 0 : i32
    %c0_i32_0 = arith.constant 0 : i32
    %c0_i32_1 = arith.constant 0 : i32
    return %c0_i32, %c0_i32_0 : i32, i32
  }
  func.func @transform_5(%arg0: i32) -> (i32, i32) {
    %c0_i32 = arith.constant 0 : i32
    %c0_i32_0 = arith.constant 0 : i32
    %c0_i32_1 = arith.constant 0 : i32
    return %c0_i32, %c0_i32_0 : i32, i32
  }
  func.func @transform_6(%arg0: i32) -> (i32, i32) {
    %c0_i32 = arith.constant 0 : i32
    %c0_i32_0 = arith.constant 0 : i32
    %c0_i32_1 = arith.constant 0 : i32
    return %c0_i32, %c0_i32_0 : i32, i32
  }
  func.func @transform_7(%arg0: i32) -> (i32, i32) {
    %c0_i32 = arith.constant 0 : i32
    %c0_i32_0 = arith.constant 0 : i32
    %c0_i32_1 = arith.constant 0 : i32
    return %c0_i32, %c0_i32_0 : i32, i32
  }
  func.func @transform_8(%arg0: i32) -> (i32, i32) {
    %c0_i32 = arith.constant 0 : i32
    %c0_i32_0 = arith.constant 0 : i32
    %c0_i32_1 = arith.constant 0 : i32
    return %c0_i32, %c0_i32_0 : i32, i32
  }
  func.func @transform_9(%arg0: i32) -> (i32, i32) {
    %c0_i32 = arith.constant 0 : i32
    %c0_i32_0 = arith.constant 0 : i32
    return %arg0, %c0_i32 : i32, i32
  }
}

</mosaic_0001>

<bundles_post_ra>
// kernel: tpu_custom_call.1
= control target key start
LH: loop header
LB: loop body
LE: loop exit
PB: predicated region body
PF: predicated region fallthrough
CT: control target
= control target key end

     0   :  { %s1937_s0 = inlined_call_operand.vmem [shape: f32[8,8,8], index: 0, kind: input, shape index: {}]   ;;  %s1938_s1 = inlined_call_operand.vmem [shape: s32[8,1], index: 1, kind: input, shape index: {}]   ;;  %s1939_s2 = inlined_call_operand.hbm [shape: bf16[8,128], index: 2, kind: input, shape index: {}]   ;;  %s1940_s3 = inlined_call_operand.vmem [shape: bf16[32,128], index: 3, kind: input, shape index: {}]   ;;  %s1941_s4 = inlined_call_operand.vmem [shape: f32[1,128], index: 4, kind: input, shape index: {}]   ;;  %s1942_s5 = inlined_call_operand.vmem [shape: f32[32,16], index: 5, kind: input, shape index: {}]   ;;  %s1943_s6 = inlined_call_operand.vmem [shape: f32[1,16], index: 6, kind: input, shape index: {}]   ;;  %s1944_s7 = inlined_call_operand.vmem [shape: f32[16,1], index: 7, kind: input, shape index: {}]   ;;  %s1945_s8 = inlined_call_operand.<no memory space> [shape: f32[1,1], index: 8, kind: input, shape index: {}]   ;;  %s1946_s9 = inlined_call_operand.vmem [shape: f32[8,1], index: 9, kind: output, shape index: {}]  }
   0x1   :  { %v14_v0 = vstv %s1945_s8 }
   0x2   :  { %15 = vst [vmem:[#allocation5] sm:$0x1] %v14_v0 }
   0x3   :  { %16 = vsyncpa [#allocation7], 0  ;;  %s1585_s11 = smov [#allocation6]  }
   0x4   :  { %s27_s12 = sshll.u32 %s1585_s11, 4  ;;  %s28_s12 = int_to_ptr.vmem [resolvable:$true] %s27_s12 }
   0x5   :  { %s1571_s13 = scalar_lea.vmem %s28_s12, 64  ;;  %p1576_p1 = scmp.lt.s32.totalorder %s28_s12, %s28_s12 }
   0x6   :  { %p1572_p0 = scmp.ne.s32.totalorder %s28_s12, %s1571_s13  ;;  %p1577_p2 = scmp.lt.s32.totalorder %s1571_s13, %s1571_s13 }
   0x8   :  { %p1578_p3 = por %p1577_p2, %p1576_p1 }
   0xa   :  { %p1579_p4 = pnand %p1578_p3, %p1572_p0 }
   0xc   :  { %1582 = shalt.err (!%p1579_p4)
}
   0xd   :  { %30 = dma.hbm_to_vmem [thread:$0]  %s1939_s2, 64, %s28_s12, [#allocation7]  }
   0xe   :  { %1583 = dma.done.wait [#allocation7], 64  }
   0xf   :  { %1584 = vsyncadd [#allocation7], 4294967232  ;;  %v1586_v1 = vmov 0.0   ;;  %vm1587_vm0 = vmmov 0   ;;  %vm157_vm1 = vcmask 261120   ;;  %vm80_vm2 = vcmask 1043456  }
  0x10   :  { %1391 = vmatprep.subr.bf16.mxu1 %v1586_v1  ;;  %1395 = vmatprep.mubr.msk.bf16.mxu1 %vm1587_vm0, %v1586_v1  ;;  %158 = vst.msk [vmem:[#allocation2] sm:$0xff] %vm157_vm1, %v1586_v1  ;;  %159 = vst.msk [vmem:[#allocation3] sm:$0xff] %vm157_vm1, %v1586_v1  ;;  %v59_v2 = vld [vmem:[#allocation6] sm:$0xf]  ;;  %v1483_v4 = vld [vmem:[%s1940_s3 + $0x8] sm:$0xff]   ;;  %vm67_vm3 = vcmask 64512  }
  0x11   :  { %1473 = vmatprep.subr.msk.bf16.mxu0 %vm80_vm2, %v59_v2  ;;  %v82_v3 = vsel %vm80_vm2, %v59_v2, 0  ;;  %v47_v5 = vld [vmem:[%s1937_s0] sm:$0xff]  ;;  %v48_v6 = vld [vmem:[%s1937_s0 + $0x8] sm:$0xff]  ;;  %v49_v8 = vld [vmem:[%s1937_s0 + $0x10] sm:$0xff]  ;;  %1392 = vmatpush3.bf16.msra.mxu1 %v1483_v4  ;;  %v1588_v23 = vmov 0   ;;  %s1589_s28 = smov 64  }
  0x12   :  { %1382 = vmatpush3.bf16.msra.mxu0 %v82_v3  ;;  %v55_v7 = vpack.c.bf16 %v48_v6, %v47_v5  ;;  %v50_v9 = vld [vmem:[%s1937_s0 + $0x18] sm:$0xff]  ;;  %v1484_v11 = vld [vmem:[%s1940_s3] sm:$0xff]   ;;  %1393 = vmatprep.subr.bf16.mxu1 %v1586_v1  ;;  %s1591_s10 = smov 96   ;;  %v1485_v39 = vld [vmem:[%s1940_s3 + $0x8] sm:$0xff]  }
  0x13   :  { %v56_v10 = vpack.c.bf16 %v50_v9, %v49_v8  ;;  %1407 = vmatprep.subr.bf16.mxu0 %v1586_v1  ;;  %v1686_v15 = vld [vmem:[%s1941_s4] ss:$0 sm:$0xff]  ;;  %1481 = vset.pattern.permute.xlu1 %v1588_v23  ;;  %s1590_s4 = smov 32  }
  0x14   :  { %1383 = vmatprep.mubr.msk.bf16.mxu0 %vm67_vm3, %v55_v7  ;;  %1482 = vset.pattern.permute.xlu0 %v1588_v23  ;;  %v1696_v29 = vld [vmem:[%s1938_s1] sm:$0xff] }
  0x15   :  { %1384 = vmatmul.mubr.msk.bf16.vlgmr.msra.gmra.mxu0 %vm67_vm3, %v56_v10  ;;  %1394 = vmatpush3.bf16.msra.mxu1 %v1484_v11  ;;  %vm253_vm4 = vcmp.gt.s32.totalorder %v1696_v29, 0  ;;  %v1486_v41 = vld [vmem:[%s1940_s3] sm:$0xff]   ;;  %vm374_vm6 = vcmp.gt.s32.totalorder %v1696_v29, 1  ;;  %v1487_v10 = vld [vmem:[%s1940_s3 + $0x8] sm:$0xff]   ;;  %vm495_vm8 = vcmp.gt.s32.totalorder %v1696_v29, 2  ;;  %vm616_vm10 = vcmp.gt.s32.totalorder %v1696_v29, 3 }
  0x16   :  { %1399 = vmatprep.subr.bf16.mxu1 %v1586_v1  ;;  %v254_v33 = vsel %vm253_vm4, 1, %v1588_v23  ;;  %v375_v2 = vsel %vm374_vm6, 1, %v1588_v23  ;;  %v51_v11 = vld [vmem:[%s1937_s0 + $0x20] sm:$0xff]  ;;  %1408 = vmatpush3.bf16.msra.mxu0 %v1487_v10  ;;  %vm737_vm12 = vcmp.gt.s32.totalorder %v1696_v29, 4  ;;  %vm858_vm14 = vcmp.gt.s32.totalorder %v1696_v29, 5 }
  0x17   :  { %v161_v12 = vld [vmem:[#allocation2] sm:$0xff]  ;;  %v230_v25 = vld [vmem:[#allocation3] sm:$0xff]  ;;  %1409 = vmatprep.subr.bf16.mxu0 %v1586_v1  ;;  %vm979_vm2 = vcmp.gt.s32.totalorder %v1696_v29, 6  ;;  %vm1100_vm4 = vcmp.gt.s32.totalorder %v1696_v29, 7 }
  0x18   :  { %v162_v13 = vpack.c.bf16 %v161_v12, %v161_v12 }
  0x1a   :  { %1396 = vmatmul.mubr.msk.bf16.vlgmr.msra.gmra.mxu1 %vm157_vm1, %v162_v13 }
  0x1b   :  { %1403 = vmatprep.mubr.msk.bf16.mxu1 %vm1587_vm0, %v1586_v1  ;;  %1400 = vmatpush3.bf16.msra.mxu1 %v1485_v39 }
  0x1c   :  { %1401 = vmatprep.subr.bf16.mxu1 %v1586_v1 }
  0x1f   :  { %1402 = vmatpush3.bf16.msra.mxu1 %v1486_v41 }
  0x20   :  { %1415 = vmatprep.subr.bf16.mxu1 %v1586_v1 }
  0xd5   :  { %v1681_v14 = vpop.f32.mrf.mxu0 }
  0xd7   :  { %v118_v16 = vpop.f32.mrf.mxu0 }
  0xd8   :  { %v119_v17 = vadd.f32 %v1686_v15, %v118_v16  ;;  %v53_v16 = vld [vmem:[%s1937_s0 + $0x30] sm:$0xff] }
  0xd9   :  { %v1720_v53 = vpop.f32.mrf.mxu0 }
  0xda   :  { %v216_v18 = vpop.f32.mrf.mxu1  ;;  %v130_v10 = vadd.f32 %v1720_v53, %v1686_v15 }
  0xdb   :  { %v222_v19 = vadd.f32 %v216_v18, %v119_v17  ;;  %v121_v54 = vpop.f32.mrf.mxu0  ;;  %v54_v17 = vld [vmem:[%s1937_s0 + $0x38] sm:$0xff] }
  0xdc   :  { %v1397_v20 = vpop.f32.mrf.mxu1  ;;  %v122_v55 = vadd.f32 %v1686_v15, %v121_v54  ;;  %v58_v18 = vpack.c.bf16 %v54_v17, %v53_v16 }
  0xdd   :  { %1499 = vtanh.f32 %v222_v19  ;;  %v1311_v26 = vmul.f32 -1.442695, %v222_v19  ;;  %v1488_v20 = vld [vmem:[%s1940_s3] sm:$0xff]  }
  0xde   :  { %v219_v21 = vpop.f32.mrf.mxu1  ;;  %1410 = vmatpush3.bf16.msra.mxu0 %v1488_v20 }
  0xdf   :  { %1501 = vpow2.f32 %v1311_v26  ;;  %1423 = vmatprep.subr.bf16.mxu0 %v1586_v1 }
  0xe0   :  { %v1398_v22 = vpop.f32.mrf.mxu1 }
  0xea   :  { %v1500_v24 = vpop.eup %1499 }
  0xeb   :  { %237 = vrot.lane.b32.xlu0 %v1500_v24, %s1589_s28 }
  0xec   :  { %v1502_v27 = vpop.eup %1501 }
  0xed   :  { %v226_v28 = vadd.f32 1.0, %v1502_v27 }
  0xef   :  { %232 = vrot.lane.b32.xlu0 %v230_v25, %s1590_s4  ;;  %1503 = vrcp.f32 %v226_v28 }
  0xfc   :  { %v1504_v30 = vpop.eup %1503 }
 0x15d   :  { %v238_v31 = vpop.permute.xlu0 %237 }
 0x15e   :  { %v240_v32 = vmul.f32 %v1504_v30, %v238_v31 }
 0x160   :  { %242 = vrot.lane.b32.xlu1 %v240_v32, %s1590_s4 }
 0x161   :  { %v233_v34 = vpop.permute.xlu0 %232 }
 0x162   :  { %v235_v35 = vmul.f32 %v1504_v30, %v233_v34 }
 0x164   :  { %256 = vperm.xlu1 %1481, %v254_v33  }
 0x168   :  { %260 = vrot.lane.b32.xlu1 %v161_v12, %s1591_s10  ;;  %v52_v12 = vld [vmem:[%s1937_s0 + $0x28] sm:$0xff] }
 0x169   :  { %v57_v13 = vpack.c.bf16 %v52_v12, %v51_v11 }
 0x16b   :  { %1387 = vmatprep.mubr.msk.bf16.mxu0 %vm67_vm3, %v57_v13 }
 0x16c   :  { %271 = vrot.lane.b32.xlu1 %v230_v25, %s1590_s4  ;;  %1388 = vmatmul.mubr.msk.bf16.gmra.mxu0 %vm67_vm3, %v58_v18 }
 0x16d   :  { %1411 = vmatprep.mubr.msk.bf16.mxu0 %vm1587_vm0, %v1586_v1 }
 0x1d2   :  { %v243_v36 = vpop.permute.xlu1 %242 }
 0x1d3   :  { %v245_v37 = vadd.f32 %v243_v36, %v235_v35  ;;  %v496_v35 = vsel %vm495_vm8, 1, %v1588_v23 }
 0x1d5   :  { %1505 = vtanh.f32 %v245_v37 }
 0x1df   :  { %v257_v40 = vpop.permute.xlu1 %256 }
 0x1e0   :  { %vm258_vm5 = vcmp.eq.s32.totalorder %v257_v40, 1  ;;  %v127_v40 = vadd.f32 %v1681_v14, %v1686_v15 }
 0x1e2   :  { %v1506_v38 = vpop.eup %1505 }
 0x1e3   :  { %248 = vrot.lane.b32.xlu0 %v1506_v38, %s1589_s28  ;;  %v261_v42 = vpop.permute.xlu1 %260 }
 0x1e7   :  { %v272_v46 = vpop.permute.xlu1 %271 }
 0x1e8   :  { %v274_v47 = vsel %vm258_vm5, %v245_v37, %v272_v46 }
 0x22c   :  { %v1766_v36 = vpop.f32.mrf.mxu0 }
 0x22e   :  { %v1768_v37 = vpop.f32.mrf.mxu0 }
 0x230   :  { %v1770_v38 = vpop.f32.mrf.mxu0 }
 0x232   :  { %v1772_v39 = vpop.f32.mrf.mxu0 }
 0x255   :  { %v249_v43 = vpop.permute.xlu0 %248 }
 0x256   :  { %v251_v44 = vmul.f32 %v1504_v30, %v249_v43 }
 0x258   :  { %v263_v45 = vsel %vm258_vm5, %v251_v44, %v261_v42 }
 0x259   :  { %265 = vrot.lane.b32.xlu0 %v263_v45, %s1590_s4 }
 0x25d   :  { %276 = vrot.lane.b32.xlu0 %v274_v47, %s1591_s10 }
 0x2cb   :  { %v266_v48 = vpop.permute.xlu0 %265 }
 0x2cc   :  { %268 = vst.msk [vmem:[#allocation2] sm:$0xff] %vm157_vm1, %v266_v48 }
 0x2cf   :  { %v277_v49 = vpop.permute.xlu0 %276 }
 0x2d0   :  { %279 = vst.msk [vmem:[#allocation3] sm:$0xff] %vm157_vm1, %v277_v49 }
 0x2d3   :  { %v282_v50 = vld [vmem:[#allocation2] sm:$0xff] }
 0x2d4   :  { %v283_v51 = vpack.c.bf16 %v282_v50, %v282_v50 }
 0x2d6   :  { %1404 = vmatmul.mubr.msk.bf16.vlgmr.msra.gmra.mxu1 %vm157_vm1, %v283_v51 }
 0x2d7   :  { %v351_v52 = vld [vmem:[#allocation3] sm:$0xff]  ;;  %1419 = vmatprep.mubr.msk.bf16.mxu1 %vm1587_vm0, %v1586_v1 }
 0x2d8   :  { %353 = vrot.lane.b32.xlu0 %v351_v52, %s1590_s4 }
 0x2dc   :  { %377 = vperm.xlu0 %1482, %v375_v2  }
 0x34a   :  { %v354_v6 = vpop.permute.xlu0 %353 }
 0x357   :  { %v378_v21 = vpop.permute.xlu0 %377 }
 0x358   :  { %vm379_vm7 = vcmp.eq.s32.totalorder %v378_v21, 1 }
 0x396   :  { %v337_v56 = vpop.f32.mrf.mxu1 }
 0x397   :  { %v343_v57 = vadd.f32 %v337_v56, %v122_v55 }
 0x398   :  { %v1405_v58 = vpop.f32.mrf.mxu1 }
 0x399   :  { %1507 = vtanh.f32 %v343_v57  ;;  %v1315_v62 = vmul.f32 -1.442695, %v343_v57  ;;  %v1489_v58 = vld [vmem:[%s1940_s3 + $0x8] sm:$0xff]  }
 0x39a   :  { %v340_v59 = vpop.f32.mrf.mxu1  ;;  %1416 = vmatpush3.bf16.msra.mxu1 %v1489_v58 }
 0x39b   :  { %1509 = vpow2.f32 %v1315_v62  ;;  %1417 = vmatprep.subr.bf16.mxu1 %v1586_v1 }
 0x39c   :  { %v1406_v60 = vpop.f32.mrf.mxu1 }
 0x39d   :  { %v1490_v60 = vld [vmem:[%s1940_s3] sm:$0xff]  }
 0x39e   :  { %1418 = vmatpush3.bf16.msra.mxu1 %v1490_v60 }
 0x39f   :  { %1431 = vmatprep.subr.bf16.mxu1 %v1586_v1 }
 0x3a6   :  { %v1508_v61 = vpop.eup %1507 }
 0x3a7   :  { %358 = vrot.lane.b32.xlu1 %v1508_v61, %s1589_s28 }
 0x3a8   :  { %v1510_v63 = vpop.eup %1509 }
 0x3a9   :  { %v347_v0 = vadd.f32 1.0, %v1510_v63 }
 0x3ab   :  { %1511 = vrcp.f32 %v347_v0 }
 0x3b8   :  { %v1512_v3 = vpop.eup %1511 }
 0x3b9   :  { %v356_v7 = vmul.f32 %v1512_v3, %v354_v6 }
 0x419   :  { %v359_v4 = vpop.permute.xlu1 %358 }
 0x41a   :  { %v361_v5 = vmul.f32 %v1512_v3, %v359_v4 }
 0x41c   :  { %363 = vrot.lane.b32.xlu1 %v361_v5, %s1590_s4 }
 0x48e   :  { %v364_v8 = vpop.permute.xlu1 %363 }
 0x48f   :  { %v366_v9 = vadd.f32 %v364_v8, %v356_v7 }
 0x491   :  { %1513 = vtanh.f32 %v366_v9 }
 0x49e   :  { %v1514_v19 = vpop.eup %1513 }
 0x49f   :  { %369 = vrot.lane.b32.xlu1 %v1514_v19, %s1589_s28 }
 0x4a3   :  { %381 = vrot.lane.b32.xlu1 %v282_v50, %s1591_s10 }
 0x4a7   :  { %392 = vrot.lane.b32.xlu1 %v351_v52, %s1590_s4 }
 0x511   :  { %v370_v22 = vpop.permute.xlu1 %369 }
 0x512   :  { %v372_v24 = vmul.f32 %v1512_v3, %v370_v22 }
 0x515   :  { %v382_v25 = vpop.permute.xlu1 %381 }
 0x516   :  { %v384_v26 = vsel %vm379_vm7, %v372_v24, %v382_v25 }
 0x517   :  { %386 = vrot.lane.b32.xlu0 %v384_v26, %s1590_s4 }
 0x519   :  { %v393_v27 = vpop.permute.xlu1 %392 }
 0x51a   :  { %v395_v28 = vsel %vm379_vm7, %v366_v9, %v393_v27  ;;  %v617_v9 = vsel %vm616_vm10, 1, %v1588_v23 }
 0x51b   :  { %397 = vrot.lane.b32.xlu0 %v395_v28, %s1591_s10 }
 0x589   :  { %v387_v30 = vpop.permute.xlu0 %386 }
 0x58a   :  { %389 = vst.msk [vmem:[#allocation2] sm:$0xff] %vm157_vm1, %v387_v30 }
 0x58d   :  { %v398_v31 = vpop.permute.xlu0 %397 }
 0x58e   :  { %400 = vst.msk [vmem:[#allocation3] sm:$0xff] %vm157_vm1, %v398_v31  ;;  %v1491_v31 = vld [vmem:[%s1940_s3 + $0x8] sm:$0xff]  }
 0x591   :  { %v403_v32 = vld [vmem:[#allocation2] sm:$0xff] }
 0x592   :  { %v404_v33 = vpack.c.bf16 %v403_v32, %v403_v32 }
 0x594   :  { %1412 = vmatmul.mubr.msk.bf16.vlgmr.msra.gmra.mxu0 %vm157_vm1, %v404_v33  ;;  %v1492_v33 = vld [vmem:[%s1940_s3] sm:$0xff]  }
 0x595   :  { %v472_v34 = vld [vmem:[#allocation3] sm:$0xff]  ;;  %1427 = vmatprep.mubr.msk.bf16.mxu0 %vm1587_vm0, %v1586_v1  ;;  %1424 = vmatpush3.bf16.msra.mxu0 %v1491_v31 }
 0x596   :  { %474 = vrot.lane.b32.xlu0 %v472_v34, %s1590_s4  ;;  %1425 = vmatprep.subr.bf16.mxu0 %v1586_v1 }
 0x599   :  { %1426 = vmatpush3.bf16.msra.mxu0 %v1492_v33 }
 0x59a   :  { %498 = vperm.xlu0 %1482, %v496_v35   ;;  %1439 = vmatprep.subr.bf16.mxu0 %v1586_v1 }
 0x59e   :  { %502 = vrot.lane.b32.xlu0 %v403_v32, %s1591_s10 }
 0x5a2   :  { %513 = vrot.lane.b32.xlu0 %v472_v34, %s1590_s4 }
 0x608   :  { %v475_v14 = vpop.permute.xlu0 %474 }
 0x615   :  { %v499_v59 = vpop.permute.xlu0 %498 }
 0x616   :  { %vm500_vm9 = vcmp.eq.s32.totalorder %v499_v59, 1 }
 0x619   :  { %v503_v61 = vpop.permute.xlu0 %502 }
 0x61d   :  { %v514_v2 = vpop.permute.xlu0 %513 }
 0x654   :  { %v458_v41 = vpop.f32.mrf.mxu0 }
 0x655   :  { %v464_v42 = vadd.f32 %v458_v41, %v127_v40 }
 0x656   :  { %v1413_v43 = vpop.f32.mrf.mxu0 }
 0x657   :  { %1515 = vtanh.f32 %v464_v42  ;;  %v1319_v47 = vmul.f32 -1.442695, %v464_v42 }
 0x658   :  { %v461_v44 = vpop.f32.mrf.mxu0 }
 0x659   :  { %1517 = vpow2.f32 %v1319_v47 }
 0x65a   :  { %v1414_v45 = vpop.f32.mrf.mxu0 }
 0x664   :  { %v1516_v46 = vpop.eup %1515 }
 0x665   :  { %479 = vrot.lane.b32.xlu1 %v1516_v46, %s1589_s28 }
 0x666   :  { %v1518_v48 = vpop.eup %1517 }
 0x667   :  { %v468_v49 = vadd.f32 1.0, %v1518_v48 }
 0x669   :  { %1519 = vrcp.f32 %v468_v49  ;;  %v738_v49 = vsel %vm737_vm12, 1, %v1588_v23 }
 0x676   :  { %v1520_v50 = vpop.eup %1519 }
 0x677   :  { %v477_v54 = vmul.f32 %v1520_v50, %v475_v14 }
 0x6d7   :  { %v480_v51 = vpop.permute.xlu1 %479 }
 0x6d8   :  { %v482_v52 = vmul.f32 %v1520_v50, %v480_v51 }
 0x6da   :  { %484 = vrot.lane.b32.xlu1 %v482_v52, %s1590_s4 }
 0x74c   :  { %v485_v55 = vpop.permute.xlu1 %484 }
 0x74d   :  { %v487_v56 = vadd.f32 %v485_v55, %v477_v54 }
 0x74f   :  { %1521 = vtanh.f32 %v487_v56  ;;  %v516_v3 = vsel %vm500_vm9, %v487_v56, %v514_v2 }
 0x75c   :  { %v1522_v57 = vpop.eup %1521 }
 0x75d   :  { %490 = vrot.lane.b32.xlu1 %v1522_v57, %s1589_s28 }
 0x7cf   :  { %v491_v62 = vpop.permute.xlu1 %490 }
 0x7d0   :  { %v493_v63 = vmul.f32 %v1520_v50, %v491_v62  ;;  %v135_v50 = vadd.f32 %v1686_v15, %v1768_v37 }
 0x7d2   :  { %v505_v0 = vsel %vm500_vm9, %v493_v63, %v503_v61 }
 0x7d3   :  { %507 = vrot.lane.b32.xlu1 %v505_v0, %s1590_s4 }
 0x7d7   :  { %518 = vrot.lane.b32.xlu1 %v516_v3, %s1591_s10 }
 0x845   :  { %v508_v4 = vpop.permute.xlu1 %507 }
 0x846   :  { %510 = vst.msk [vmem:[#allocation2] sm:$0xff] %vm157_vm1, %v508_v4  ;;  %v1493_v4 = vld [vmem:[%s1940_s3 + $0x8] sm:$0xff]  }
 0x849   :  { %v519_v5 = vpop.permute.xlu1 %518 }
 0x84a   :  { %521 = vst.msk [vmem:[#allocation3] sm:$0xff] %vm157_vm1, %v519_v5 }
 0x84d   :  { %v524_v6 = vld [vmem:[#allocation2] sm:$0xff] }
 0x84e   :  { %v525_v7 = vpack.c.bf16 %v524_v6, %v524_v6 }
 0x850   :  { %1420 = vmatmul.mubr.msk.bf16.vlgmr.msra.gmra.mxu1 %vm157_vm1, %v525_v7 }
 0x851   :  { %v593_v8 = vld [vmem:[#allocation3] sm:$0xff]  ;;  %1435 = vmatprep.mubr.msk.bf16.mxu1 %vm1587_vm0, %v1586_v1  ;;  %1432 = vmatpush3.bf16.msra.mxu1 %v1493_v4 }
 0x852   :  { %595 = vrot.lane.b32.xlu1 %v593_v8, %s1590_s4  ;;  %1433 = vmatprep.subr.bf16.mxu1 %v1586_v1 }
 0x856   :  { %619 = vperm.xlu1 %1481, %v617_v9  }
 0x85a   :  { %623 = vrot.lane.b32.xlu1 %v524_v6, %s1591_s10  ;;  %v1494_v6 = vld [vmem:[%s1940_s3] sm:$0xff]  }
 0x85b   :  { %1434 = vmatpush3.bf16.msra.mxu1 %v1494_v6 }
 0x85c   :  { %1447 = vmatprep.subr.bf16.mxu1 %v1586_v1 }
 0x85e   :  { %634 = vrot.lane.b32.xlu1 %v593_v8, %s1590_s4 }
 0x8c4   :  { %v596_v53 = vpop.permute.xlu1 %595 }
 0x8d1   :  { %v620_v32 = vpop.permute.xlu1 %619 }
 0x8d2   :  { %vm621_vm11 = vcmp.eq.s32.totalorder %v620_v32, 1 }
 0x8d5   :  { %v624_v34 = vpop.permute.xlu1 %623 }
 0x8d9   :  { %v635_v42 = vpop.permute.xlu1 %634 }
 0x910   :  { %v579_v11 = vpop.f32.mrf.mxu1 }
 0x911   :  { %v585_v12 = vadd.f32 %v579_v11, %v130_v10 }
 0x912   :  { %v1421_v13 = vpop.f32.mrf.mxu1 }
 0x913   :  { %1523 = vtanh.f32 %v585_v12  ;;  %v1323_v19 = vmul.f32 -1.442695, %v585_v12 }
 0x914   :  { %v582_v16 = vpop.f32.mrf.mxu1 }
 0x915   :  { %1525 = vpow2.f32 %v1323_v19 }
 0x916   :  { %v1422_v17 = vpop.f32.mrf.mxu1 }
 0x920   :  { %v1524_v18 = vpop.eup %1523 }
 0x921   :  { %600 = vrot.lane.b32.xlu0 %v1524_v18, %s1589_s28 }
 0x922   :  { %v1526_v20 = vpop.eup %1525 }
 0x923   :  { %v589_v21 = vadd.f32 1.0, %v1526_v20  ;;  %v859_v20 = vsel %vm858_vm14, 1, %v1588_v23 }
 0x925   :  { %1527 = vrcp.f32 %v589_v21  ;;  %v138_v21 = vadd.f32 %v1686_v15, %v1772_v39 }
 0x932   :  { %v1528_v22 = vpop.eup %1527 }
 0x933   :  { %v598_v26 = vmul.f32 %v1528_v22, %v596_v53 }
 0x993   :  { %v601_v24 = vpop.permute.xlu0 %600 }
 0x994   :  { %v603_v25 = vmul.f32 %v1528_v22, %v601_v24 }
 0x996   :  { %605 = vrot.lane.b32.xlu0 %v603_v25, %s1590_s4 }
 0xa08   :  { %v606_v27 = vpop.permute.xlu0 %605 }
 0xa09   :  { %v608_v28 = vadd.f32 %v606_v27, %v598_v26 }
 0xa0b   :  { %1529 = vtanh.f32 %v608_v28  ;;  %v637_v43 = vsel %vm621_vm11, %v608_v28, %v635_v42 }
 0xa18   :  { %v1530_v30 = vpop.eup %1529 }
 0xa19   :  { %611 = vrot.lane.b32.xlu0 %v1530_v30, %s1589_s28 }
 0xa8b   :  { %v612_v35 = vpop.permute.xlu0 %611 }
 0xa8c   :  { %v614_v40 = vmul.f32 %v1528_v22, %v612_v35 }
 0xa8e   :  { %v626_v41 = vsel %vm621_vm11, %v614_v40, %v624_v34 }
 0xa8f   :  { %628 = vrot.lane.b32.xlu0 %v626_v41, %s1590_s4 }
 0xa93   :  { %639 = vrot.lane.b32.xlu0 %v637_v43, %s1591_s10  ;;  %v1495_v43 = vld [vmem:[%s1940_s3 + $0x8] sm:$0xff]  }
 0xb01   :  { %v629_v44 = vpop.permute.xlu0 %628 }
 0xb02   :  { %631 = vst.msk [vmem:[#allocation2] sm:$0xff] %vm157_vm1, %v629_v44 }
 0xb05   :  { %v640_v45 = vpop.permute.xlu0 %639 }
 0xb06   :  { %642 = vst.msk [vmem:[#allocation3] sm:$0xff] %vm157_vm1, %v640_v45  ;;  %v1496_v45 = vld [vmem:[%s1940_s3] sm:$0xff]  }
 0xb09   :  { %v645_v46 = vld [vmem:[#allocation2] sm:$0xff] }
 0xb0a   :  { %v646_v47 = vpack.c.bf16 %v645_v46, %v645_v46 }
 0xb0c   :  { %1428 = vmatmul.mubr.msk.bf16.vlgmr.msra.gmra.mxu0 %vm157_vm1, %v646_v47 }
 0xb0d   :  { %v714_v48 = vld [vmem:[#allocation3] sm:$0xff]  ;;  %1443 = vmatprep.mubr.msk.bf16.mxu0 %vm1587_vm0, %v1586_v1  ;;  %1440 = vmatpush3.bf16.msra.mxu0 %v1495_v43 }
 0xb0e   :  { %716 = vrot.lane.b32.xlu0 %v714_v48, %s1590_s4  ;;  %1441 = vmatprep.subr.bf16.mxu0 %v1586_v1 }
 0xb11   :  { %1442 = vmatpush3.bf16.msra.mxu0 %v1496_v45 }
 0xb12   :  { %740 = vperm.xlu0 %1482, %v738_v49   ;;  %1455 = vmatprep.subr.mxu0 %v1586_v1 }
 0xb16   :  { %744 = vrot.lane.b32.xlu0 %v645_v46, %s1591_s10 }
 0xb1a   :  { %755 = vrot.lane.b32.xlu0 %v714_v48, %s1590_s4 }
 0xb80   :  { %v717_v37 = vpop.permute.xlu0 %716 }
 0xb8d   :  { %v741_v5 = vpop.permute.xlu0 %740 }
 0xb8e   :  { %vm742_vm13 = vcmp.eq.s32.totalorder %v741_v5, 1 }
 0xb91   :  { %v745_v7 = vpop.permute.xlu0 %744 }
 0xb95   :  { %v756_v11 = vpop.permute.xlu0 %755 }
 0xbcc   :  { %v700_v51 = vpop.f32.mrf.mxu0 }
 0xbcd   :  { %v706_v52 = vadd.f32 %v700_v51, %v135_v50 }
 0xbce   :  { %v1429_v14 = vpop.f32.mrf.mxu0 }
 0xbcf   :  { %1531 = vtanh.f32 %v706_v52  ;;  %v1327_v57 = vmul.f32 -1.442695, %v706_v52 }
 0xbd0   :  { %v703_v54 = vpop.f32.mrf.mxu0 }
 0xbd1   :  { %1533 = vpow2.f32 %v1327_v57  ;;  %v980_v57 = vsel %vm979_vm2, 1, %v1588_v23 }
 0xbd2   :  { %v1430_v55 = vpop.f32.mrf.mxu0 }
 0xbdc   :  { %v1532_v56 = vpop.eup %1531 }
 0xbdd   :  { %721 = vrot.lane.b32.xlu1 %v1532_v56, %s1589_s28 }
 0xbde   :  { %v1534_v58 = vpop.eup %1533 }
 0xbdf   :  { %v710_v59 = vadd.f32 1.0, %v1534_v58  ;;  %v143_v58 = vadd.f32 %v1766_v36, %v1686_v15 }
 0xbe1   :  { %1535 = vrcp.f32 %v710_v59 }
 0xbee   :  { %v1536_v60 = vpop.eup %1535 }
 0xbef   :  { %v719_v63 = vmul.f32 %v1536_v60, %v717_v37 }
 0xc4f   :  { %v722_v61 = vpop.permute.xlu1 %721 }
 0xc50   :  { %v724_v62 = vmul.f32 %v1536_v60, %v722_v61 }
 0xc52   :  { %726 = vrot.lane.b32.xlu1 %v724_v62, %s1590_s4 }
 0xcc4   :  { %v727_v0 = vpop.permute.xlu1 %726 }
 0xcc5   :  { %v729_v2 = vadd.f32 %v727_v0, %v719_v63 }
 0xcc7   :  { %1537 = vtanh.f32 %v729_v2  ;;  %v758_v12 = vsel %vm742_vm13, %v729_v2, %v756_v11  ;;  %v1497_v11 = vld [vmem:[%s1940_s3 + $0x8] sm:$0xff]  }
 0xcd4   :  { %v1538_v3 = vpop.eup %1537 }
 0xcd5   :  { %732 = vrot.lane.b32.xlu1 %v1538_v3, %s1589_s28 }
 0xd47   :  { %v733_v8 = vpop.permute.xlu1 %732 }
 0xd48   :  { %v735_v9 = vmul.f32 %v1536_v60, %v733_v8 }
 0xd4a   :  { %v747_v10 = vsel %vm742_vm13, %v735_v9, %v745_v7 }
 0xd4b   :  { %749 = vrot.lane.b32.xlu1 %v747_v10, %s1590_s4 }
 0xd4f   :  { %760 = vrot.lane.b32.xlu1 %v758_v12, %s1591_s10 }
 0xdbd   :  { %v750_v13 = vpop.permute.xlu1 %749 }
 0xdbe   :  { %752 = vst.msk [vmem:[#allocation2] sm:$0xff] %vm157_vm1, %v750_v13  ;;  %v1498_v13 = vld [vmem:[%s1940_s3] sm:$0xff]  }
 0xdc1   :  { %v761_v16 = vpop.permute.xlu1 %760 }
 0xdc2   :  { %763 = vst.msk [vmem:[#allocation3] sm:$0xff] %vm157_vm1, %v761_v16 }
 0xdc5   :  { %v766_v17 = vld [vmem:[#allocation2] sm:$0xff] }
 0xdc6   :  { %v767_v18 = vpack.c.bf16 %v766_v17, %v766_v17 }
 0xdc8   :  { %1436 = vmatmul.mubr.msk.bf16.vlgmr.msra.gmra.mxu1 %vm157_vm1, %v767_v18 }
 0xdc9   :  { %v835_v19 = vld [vmem:[#allocation3] sm:$0xff]  ;;  %1451 = vmatprep.mubr.msk.bf16.mxu1 %vm1587_vm0, %v1586_v1  ;;  %1448 = vmatpush3.bf16.msra.mxu1 %v1497_v11 }
 0xdca   :  { %837 = vrot.lane.b32.xlu1 %v835_v19, %s1590_s4  ;;  %1449 = vmatprep.subr.bf16.mxu1 %v1586_v1 }
 0xdcd   :  { %1450 = vmatpush3.bf16.msra.mxu1 %v1498_v13 }
 0xdce   :  { %861 = vperm.xlu1 %1481, %v859_v20  }
 0xdd2   :  { %865 = vrot.lane.b32.xlu1 %v766_v17, %s1591_s10 }
 0xdd6   :  { %876 = vrot.lane.b32.xlu1 %v835_v19, %s1590_s4 }
 0xe3c   :  { %v838_v39 = vpop.permute.xlu1 %837 }
 0xe49   :  { %v862_v44 = vpop.permute.xlu1 %861 }
 0xe4a   :  { %vm863_vm15 = vcmp.eq.s32.totalorder %v862_v44, 1 }
 0xe4d   :  { %v866_v46 = vpop.permute.xlu1 %865 }
 0xe51   :  { %v877_v50 = vpop.permute.xlu1 %876 }
 0xe88   :  { %v821_v22 = vpop.f32.mrf.mxu1 }
 0xe89   :  { %v827_v24 = vadd.f32 %v821_v22, %v138_v21 }
 0xe8a   :  { %v1437_v25 = vpop.f32.mrf.mxu1 }
 0xe8b   :  { %1539 = vtanh.f32 %v827_v24  ;;  %v1331_v28 = vmul.f32 -1.442695, %v827_v24 }
 0xe8c   :  { %v824_v53 = vpop.f32.mrf.mxu1 }
 0xe8d   :  { %1541 = vpow2.f32 %v1331_v28  ;;  %v146_v28 = vadd.f32 %v1770_v38, %v1686_v15 }
 0xe8e   :  { %v1438_v26 = vpop.f32.mrf.mxu1 }
 0xe98   :  { %v1540_v27 = vpop.eup %1539 }
 0xe99   :  { %842 = vrot.lane.b32.xlu0 %v1540_v27, %s1589_s28  ;;  %v1101_v27 = vsel %vm1100_vm4, 1, %v1588_v23 }
 0xe9a   :  { %v1542_v30 = vpop.eup %1541 }
 0xe9b   :  { %v831_v31 = vadd.f32 1.0, %v1542_v30 }
 0xe9d   :  { %1543 = vrcp.f32 %v831_v31 }
 0xeaa   :  { %v1544_v32 = vpop.eup %1543 }
 0xeab   :  { %v840_v35 = vmul.f32 %v1544_v32, %v838_v39 }
 0xf0b   :  { %v843_v33 = vpop.permute.xlu0 %842 }
 0xf0c   :  { %v845_v34 = vmul.f32 %v1544_v32, %v843_v33 }
 0xf0e   :  { %847 = vrot.lane.b32.xlu0 %v845_v34, %s1590_s4 }
 0xf80   :  { %v848_v40 = vpop.permute.xlu0 %847 }
 0xf81   :  { %v850_v41 = vadd.f32 %v848_v40, %v840_v35 }
 0xf83   :  { %1545 = vtanh.f32 %v850_v41  ;;  %v879_v51 = vsel %vm863_vm15, %v850_v41, %v877_v50  ;;  %v1128_v50 = vld [vmem:[%s1942_s5] sm:$0xff] }
 0xf90   :  { %v1546_v42 = vpop.eup %1545 }
 0xf91   :  { %853 = vrot.lane.b32.xlu0 %v1546_v42, %s1589_s28 }
0x1003   :  { %v854_v47 = vpop.permute.xlu0 %853 }
0x1004   :  { %v856_v48 = vmul.f32 %v1544_v32, %v854_v47  ;;  %v1130_v47 = vld [vmem:[%s1942_s5 + $0x10] sm:$0xff] }
0x1006   :  { %v868_v49 = vsel %vm863_vm15, %v856_v48, %v866_v46  ;;  %v1131_v46 = vld [vmem:[%s1942_s5 + $0x18] sm:$0xff] }
0x1007   :  { %870 = vrot.lane.b32.xlu0 %v868_v49, %s1590_s4  ;;  %v1129_v49 = vld [vmem:[%s1942_s5 + $0x8] sm:$0xff] }
0x100b   :  { %881 = vrot.lane.b32.xlu0 %v879_v51, %s1591_s10 }
0x1079   :  { %v871_v52 = vpop.permute.xlu0 %870 }
0x107a   :  { %873 = vst.msk [vmem:[#allocation2] sm:$0xff] %vm157_vm1, %v871_v52 }
0x107d   :  { %v882_v14 = vpop.permute.xlu0 %881 }
0x107e   :  { %884 = vst.msk [vmem:[#allocation3] sm:$0xff] %vm157_vm1, %v882_v14 }
0x1081   :  { %v887_v54 = vld [vmem:[#allocation2] sm:$0xff] }
0x1082   :  { %v888_v55 = vpack.c.bf16 %v887_v54, %v887_v54 }
0x1084   :  { %1444 = vmatmul.mubr.msk.bf16.vlgmr.msra.gmra.mxu0 %vm157_vm1, %v888_v55 }
0x1085   :  { %v956_v56 = vld [vmem:[#allocation3] sm:$0xff]  ;;  %1463 = vmatprep.mubr.msk.f32.mxu0 %vm1587_vm0, %v1586_v1  ;;  %1456 = vmatpush3.msra.mxu0 %v1131_v46 }
0x1086   :  { %958 = vrot.lane.b32.xlu0 %v956_v56, %s1590_s4  ;;  %1457 = vmatprep.subr.mxu0 %v1586_v1 }
0x1087   :  { %1458 = vmatpush3.msra.mxu0 %v1130_v47 }
0x1088   :  { %1459 = vmatprep.subr.mxu0 %v1586_v1 }
0x1089   :  { %1460 = vmatpush3.msra.mxu0 %v1129_v49 }
0x108a   :  { %982 = vperm.xlu0 %1482, %v980_v57   ;;  %1461 = vmatprep.subr.mxu0 %v1586_v1 }
0x108b   :  { %1462 = vmatpush3.msra.mxu0 %v1128_v50 }
0x108c   :  { %1466 = vmatprep.subr.mxu0 %v1586_v1 }
0x108e   :  { %986 = vrot.lane.b32.xlu0 %v887_v54, %s1591_s10 }
0x1092   :  { %997 = vrot.lane.b32.xlu0 %v956_v56, %s1590_s4 }
0x10f8   :  { %v959_v36 = vpop.permute.xlu0 %958 }
0x1105   :  { %v983_v12 = vpop.permute.xlu0 %982 }
0x1106   :  { %vm984_vm3 = vcmp.eq.s32.totalorder %v983_v12, 1 }
0x1109   :  { %v987_v16 = vpop.permute.xlu0 %986 }
0x110d   :  { %v998_v20 = vpop.permute.xlu0 %997 }
0x1144   :  { %v942_v59 = vpop.f32.mrf.mxu0 }
0x1145   :  { %v948_v60 = vadd.f32 %v942_v59, %v143_v58 }
0x1146   :  { %v1445_v61 = vpop.f32.mrf.mxu0 }
0x1147   :  { %1547 = vtanh.f32 %v948_v60  ;;  %v1335_v0 = vmul.f32 -1.442695, %v948_v60  ;;  %v1214_v60 = vld [vmem:[%s1944_s7 + $0x8] sm:$0xff]  ;;  %v1213_v61 = vld [vmem:[%s1944_s7] sm:$0xff] }
0x1148   :  { %v945_v62 = vpop.f32.mrf.mxu0 }
0x1149   :  { %1549 = vpow2.f32 %v1335_v0  ;;  %v1340_v62 = vld [vmem:[%s1943_s6] ss:$0 sm:$0xff] }
0x114a   :  { %v1446_v37 = vpop.f32.mrf.mxu0 }
0x1154   :  { %v1548_v63 = vpop.eup %1547 }
0x1155   :  { %963 = vrot.lane.b32.xlu1 %v1548_v63, %s1589_s28 }
0x1156   :  { %v1550_v2 = vpop.eup %1549 }
0x1157   :  { %v952_v3 = vadd.f32 1.0, %v1550_v2 }
0x1159   :  { %1551 = vrcp.f32 %v952_v3  ;;  %v1342_v3 = vld [vmem:[#allocation5] ss:$0 sm:$0xff] }
0x1166   :  { %v1552_v4 = vpop.eup %1551 }
0x1167   :  { %v961_v7 = vmul.f32 %v1552_v4, %v959_v36 }
0x11c7   :  { %v964_v5 = vpop.permute.xlu1 %963 }
0x11c8   :  { %v966_v6 = vmul.f32 %v1552_v4, %v964_v5 }
0x11ca   :  { %968 = vrot.lane.b32.xlu1 %v966_v6, %s1590_s4 }
0x123c   :  { %v969_v8 = vpop.permute.xlu1 %968 }
0x123d   :  { %v971_v9 = vadd.f32 %v969_v8, %v961_v7 }
0x123f   :  { %1553 = vtanh.f32 %v971_v9  ;;  %v1000_v21 = vsel %vm984_vm3, %v971_v9, %v998_v20 }
0x124c   :  { %v1554_v10 = vpop.eup %1553 }
0x124d   :  { %974 = vrot.lane.b32.xlu1 %v1554_v10, %s1589_s28 }
0x12bf   :  { %v975_v17 = vpop.permute.xlu1 %974 }
0x12c0   :  { %v977_v18 = vmul.f32 %v1552_v4, %v975_v17 }
0x12c2   :  { %v989_v19 = vsel %vm984_vm3, %v977_v18, %v987_v16 }
0x12c3   :  { %991 = vrot.lane.b32.xlu1 %v989_v19, %s1590_s4 }
0x12c7   :  { %1002 = vrot.lane.b32.xlu1 %v1000_v21, %s1591_s10 }
0x1335   :  { %v992_v22 = vpop.permute.xlu1 %991 }
0x1336   :  { %994 = vst.msk [vmem:[#allocation2] sm:$0xff] %vm157_vm1, %v992_v22 }
0x1339   :  { %v1003_v24 = vpop.permute.xlu1 %1002 }
0x133a   :  { %1005 = vst.msk [vmem:[#allocation3] sm:$0xff] %vm157_vm1, %v1003_v24 }
0x133d   :  { %v1008_v25 = vld [vmem:[#allocation2] sm:$0xff] }
0x133e   :  { %v1009_v53 = vpack.c.bf16 %v1008_v25, %v1008_v25 }
0x1340   :  { %1452 = vmatmul.mubr.msk.bf16.vlgmr.msra.gmra.mxu1 %vm157_vm1, %v1009_v53 }
0x1341   :  { %v1077_v26 = vld [vmem:[#allocation3] sm:$0xff] }
0x1342   :  { %1079 = vrot.lane.b32.xlu1 %v1077_v26, %s1590_s4 }
0x1346   :  { %1103 = vperm.xlu1 %1481, %v1101_v27  }
0x134a   :  { %1107 = vrot.lane.b32.xlu1 %v1008_v25, %s1591_s10 }
0x134e   :  { %1118 = vrot.lane.b32.xlu1 %v1077_v26, %s1590_s4 }
0x13b4   :  { %v1080_v15 = vpop.permute.xlu1 %1079 }
0x13c1   :  { %v1104_v48 = vpop.permute.xlu1 %1103 }
0x13c2   :  { %vm1105_vm5 = vcmp.eq.s32.totalorder %v1104_v48, 1 }
0x13c5   :  { %v1108_v51 = vpop.permute.xlu1 %1107 }
0x13c9   :  { %v1119_v55 = vpop.permute.xlu1 %1118 }
0x1400   :  { %v1063_v30 = vpop.f32.mrf.mxu1 }
0x1401   :  { %v1069_v31 = vadd.f32 %v1063_v30, %v146_v28 }
0x1402   :  { %v1453_v32 = vpop.f32.mrf.mxu1 }
0x1403   :  { %1555 = vtanh.f32 %v1069_v31  ;;  %v1339_v39 = vmul.f32 -1.442695, %v1069_v31 }
0x1404   :  { %v1066_v33 = vpop.f32.mrf.mxu1 }
0x1405   :  { %1557 = vpow2.f32 %v1339_v39 }
0x1406   :  { %v1454_v34 = vpop.f32.mrf.mxu1 }
0x1410   :  { %v1556_v29 = vpop.eup %1555 }
0x1411   :  { %1084 = vrot.lane.b32.xlu0 %v1556_v29, %s1589_s28 }
0x1412   :  { %v1558_v23 = vpop.eup %1557 }
0x1413   :  { %v1073_v35 = vadd.f32 1.0, %v1558_v23 }
0x1415   :  { %1559 = vrcp.f32 %v1073_v35 }
0x1422   :  { %v1560_v40 = vpop.eup %1559 }
0x1423   :  { %v1082_v38 = vmul.f32 %v1560_v40, %v1080_v15 }
0x1483   :  { %v1085_v41 = vpop.permute.xlu0 %1084 }
0x1484   :  { %v1087_v42 = vmul.f32 %v1560_v40, %v1085_v41 }
0x1486   :  { %1089 = vrot.lane.b32.xlu0 %v1087_v42, %s1590_s4 }
0x14f8   :  { %v1090_v43 = vpop.permute.xlu0 %1089 }
0x14f9   :  { %v1092_v44 = vadd.f32 %v1090_v43, %v1082_v38 }
0x14fb   :  { %1561 = vtanh.f32 %v1092_v44  ;;  %v1121_v56 = vsel %vm1105_vm5, %v1092_v44, %v1119_v55 }
0x1508   :  { %v1562_v45 = vpop.eup %1561 }
0x1509   :  { %1095 = vrot.lane.b32.xlu0 %v1562_v45, %s1589_s28 }
0x157b   :  { %v1096_v52 = vpop.permute.xlu0 %1095 }
0x157c   :  { %v1098_v14 = vmul.f32 %v1560_v40, %v1096_v52 }
0x157e   :  { %v1110_v54 = vsel %vm1105_vm5, %v1098_v14, %v1108_v51 }
0x157f   :  { %1112 = vrot.lane.b32.xlu0 %v1110_v54, %s1590_s4 }
0x1583   :  { %1123 = vrot.lane.b32.xlu0 %v1121_v56, %s1591_s10 }
0x15f1   :  { %v1113_v57 = vpop.permute.xlu0 %1112 }
0x15f2   :  { %1115 = vst.msk [vmem:[#allocation2] sm:$0xff] %vm157_vm1, %v1113_v57 }
0x15f5   :  { %v1124_v58 = vpop.permute.xlu0 %1123 }
0x15f6   :  { %1126 = vst.msk [vmem:[#allocation3] sm:$0xff] %vm157_vm1, %v1124_v58 }
0x15f9   :  { %v1127_v59 = vld [vmem:[#allocation2] sm:$0xff] }
0x15fa   :  { %1464 = vmatmul.mubr.msk.f32.vlgmr.msra.gmra.mxu0 %vm157_vm1, %v1127_v59  ;;  %vm1296_vm1 = vcmask 7168  }
0x15fb   :  { %1470 = vmatprep.mubr.msk.f32.mxu0 %vm1587_vm0, %v1586_v1  ;;  %1467 = vmatpush3.msra.mxu0 %v1214_v60  ;;  %vm1222_vm0 = vcmask 130048  }
0x15fc   :  { %1468 = vmatprep.subr.mxu0 %v1586_v1 }
0x15fd   :  { %1469 = vmatpush3.msra.mxu0 %v1213_v61 }
0x16ba   :  { %v1208_v37 = vpop.f32.mrf.mxu0 }
0x16bb   :  { %v1209_v63 = vadd.f32 %v1340_v62, %v1208_v37 }
0x16bc   :  { %v1465_v0 = vpop.f32.mrf.mxu0 }
0x16bd   :  { %v1212_v2 = vmax.f32 %v1209_v63, 0.0 }
0x16bf   :  { %1471 = vmatmul.mubr.msk.f32.vlgmr.msra.gmra.mxu0 %vm1222_vm0, %v1212_v2 }
0x177f   :  { %v1292_v4 = vpop.f32.mrf.mxu0 }
0x1780   :  { %v1293_v5 = vadd.f32 %v1342_v3, %v1292_v4 }
0x1781   :  { %v1472_v1 = vpop.f32.mrf.mxu0 }
0x1782   :  { %1297 = vst.msk [vmem:[%s1946_s9] sm:$0xff] %vm1296_vm1, %v1293_v5 }
0x1783   :  { %1302 = vsyncpa [#allocation7], 1 }

</bundles_post_ra>
